<compile_context>
chip_gen: v7x
topology: tpu7x:2x2x1
jax: 0.10.0
libtpu: 0.0.40
codegen_flags: <defaults>
</compile_context>

<pallas_src>
import jax
import jax.numpy as jnp
from jax.experimental import pallas as pl
from jax.experimental.pallas import tpu as pltpu

HIDDEN_DIM = 128
FFN_DIM = 256
NUM_ROUTED_EXPERTS = 8
TOP_K = 2
SEQ_LEN = 5
BATCH = 2

E1 = NUM_ROUTED_EXPERTS + 1          # shared expert + routed experts
EF = E1 * FFN_DIM                    # flattened expert*ffn axis


# ----------------------------- Pallas kernel ------------------------------

def moe_fused_kernel(x_ref, coef_ref, w13_ref, w2_ref, o_ref):
    """Fully fused MoE step for one token tile.

    x_ref    : VMEM bf16 [TM, D]
    coef_ref : VMEM f32  [TM, E1*F]   per-token coef, broadcast over F lanes
               (block 0 = shared expert = 1.0; blocks 1.. = routed weights,
                0 for unselected tokens -> exact masked-scatter semantics)
    w13_ref  : VMEM bf16 [D, E1*2F]   fused [all w1 | all w3]
    w2_ref   : VMEM bf16 [E1*F, D]    fused down-projection
    o_ref    : VMEM x.dtype [TM, D]
    """
    x = x_ref[...]                                            # (TM, D) bf16

    # One wide up-projection for ALL experts (single MXU op, lane width E1*2F).
    h13 = jnp.dot(x, w13_ref[...], preferred_element_type=jnp.float32)
    h1 = h13[:, :EF]                                          # (TM, E1*F)
    h3 = h13[:, EF:]                                          # (TM, E1*F)

    # SiLU gating in f32 (v5e has no bf16 VPU/EUP), fold routing coef into h.
    h = (h1 * jax.nn.sigmoid(h1)) * h3
    h = h * coef_ref[...]

    # One down-projection with MXU-side accumulation over the E1*F axis.
    y = jnp.dot(h.astype(jnp.bfloat16), w2_ref[...],
                preferred_element_type=jnp.float32)           # (TM, D)
    o_ref[...] = y.astype(o_ref.dtype)


# ------------------------------- wrapper ----------------------------------

def _route(xf, gate_w):
    """Router glue (logits / softmax / top-k / renormalize) -- plain XLA."""
    logits = jnp.dot(xf, gate_w, preferred_element_type=jnp.float32)
    probs = jax.nn.softmax(logits.astype(jnp.float32), axis=1)
    vals, idx = jax.lax.top_k(probs, TOP_K)
    vals = vals / jnp.sum(vals, axis=-1, keepdims=True)
    return vals, idx                                          # f32 end-to-end


def prepare_moe_weights(params):
    """One-time parameter preparation (hoisted out of the forward path)."""
    D, F = HIDDEN_DIM, FFN_DIM
    # [all w1 | all w3] along N, so column block e of h1/h3 = expert e.
    w1_all = jnp.transpose(params["w1"], (1, 0, 2)).reshape(D, E1 * F)
    w3_all = jnp.transpose(params["w3"], (1, 0, 2)).reshape(D, E1 * F)
    w13 = jnp.concatenate([w1_all, w3_all], axis=1).astype(jnp.bfloat16)
    w2 = params["w2"].reshape(E1 * F, D).astype(jnp.bfloat16)
    return {"w13": w13, "w2": w2, "gate": params["gate"]}


def moe_forward(x, prepped):
    bs, seq, dim = x.shape
    T = bs * seq
    F = FFN_DIM
    E = NUM_ROUTED_EXPERTS

    # Token tile (multiple of 8 sublanes); "parallel" grid axis shards tiles
    # across v7x's two TensorCores once there is more than one tile.
    TM = min(128, ((T + 7) // 8) * 8)
    Tp = ((T + TM - 1) // TM) * TM
    num_tiles = Tp // TM

    xf = x.reshape(T, dim).astype(jnp.float32)

    # --- routing (tiny; plain XLA) -> dense per-token coefficient table ----
    vals, idx = _route(xf, prepped["gate"])                        # [T, K]
    onehot = jax.nn.one_hot(idx, E, dtype=jnp.float32)             # [T, K, E]
    routed = jnp.einsum("tke,tk->te", onehot, vals)                # [T, E]
    coef = jnp.concatenate([jnp.ones((T, 1), jnp.float32), routed], axis=1)
    coef = jnp.pad(coef, ((0, Tp - T), (0, 0)))                    # [Tp, E1]
    # Lane-dense expansion: column block e (width F) holds coef[:, e].
    coef_exp = jnp.repeat(coef, F, axis=1)                         # [Tp, E1*F]

    x_pad = jnp.pad(xf, ((0, Tp - T), (0, 0))).astype(jnp.bfloat16)

    out = pl.pallas_call(
        moe_fused_kernel,
        out_shape=jax.ShapeDtypeStruct((Tp, dim), x.dtype),
        grid_spec=pltpu.PrefetchScalarGridSpec(
            num_scalar_prefetch=0,
            grid=(num_tiles,),
            in_specs=[
                pl.BlockSpec((TM, dim), lambda i: (i, 0)),          # x tile
                pl.BlockSpec((TM, EF), lambda i: (i, 0)),           # coef tile
                pl.BlockSpec((dim, 2 * EF), lambda i: (0, 0)),      # w13 (resident)
                pl.BlockSpec((EF, dim), lambda i: (0, 0)),          # w2  (resident)
            ],
            out_specs=pl.BlockSpec((TM, dim), lambda i: (i, 0)),
        ),
        compiler_params=pltpu.CompilerParams(
            dimension_semantics=("parallel",)),
    )(x_pad, coef_exp, prepped["w13"], prepped["w2"])

    return out[:T].reshape(bs, seq, dim)


# --------------------------- reference (pure JAX) --------------------------
# Mirrors the original torch structure (per-expert masked accumulation,
# coef applied AFTER the expert) with bf16 MXU operands / f32 accumulation,
# and shares the routing path so top-k decisions match exactly.

def moe_reference(x, params):
    bs, seq, dim = x.shape
    xf = x.reshape(-1, dim).astype(jnp.float32)
    vals, idx = _route(xf, params["gate"])

    x_bf = xf.astype(jnp.bfloat16)
    w1 = params["w1"].astype(jnp.bfloat16)
    w3 = params["w3"].astype(jnp.bfloat16)
    w2 = params["w2"].astype(jnp.bfloat16)

    def expert(e):
        h1 = jnp.dot(x_bf, w1[e], preferred_element_type=jnp.float32)
        h3 = jnp.dot(x_bf, w3[e], preferred_element_type=jnp.float32)
        h = (h1 * jax.nn.sigmoid(h1)) * h3
        return jnp.dot(h.astype(jnp.bfloat16), w2[e],
                       preferred_element_type=jnp.float32)

    out = expert(0)                                    # shared expert
    for k in range(TOP_K):
        for e in range(NUM_ROUTED_EXPERTS):
            w = jnp.where(idx[:, k] == e, vals[:, k], 0.0)[:, None]
            out = out + w * expert(e + 1)
    return out.reshape(bs, seq, dim).astype(x.dtype)


# ------------------------------ parameters ---------------------------------

def init_params(key):
    k1, k2, k3, kg = jax.random.split(key, 4)
    scale = 0.02
    return {
        "w1": scale * jax.random.normal(k1, (E1, HIDDEN_DIM, FFN_DIM), jnp.float32),
        "w3": scale * jax.random.normal(k3, (E1, HIDDEN_DIM, FFN_DIM), jnp.float32),
        "w2": scale * jax.random.normal(k2, (E1, FFN_DIM, HIDDEN_DIM), jnp.float32),
        "gate": scale * jax.random.normal(kg, (HIDDEN_DIM, NUM_ROUTED_EXPERTS), jnp.float32),
    }


if __name__ == "__main__":
    key = jax.random.PRNGKey(0)
    kx, kp = jax.random.split(key)
    x = jax.random.normal(kx, (BATCH, SEQ_LEN, HIDDEN_DIM), jnp.float32)
    params = init_params(kp)

    # One-time weight fusion / bf16 cast (hoisted out of the forward path).
    prepped = prepare_moe_weights(params)

    fwd = jax.jit(moe_forward)
    out = jax.block_until_ready(fwd(x, prepped))
    ref = jax.block_until_ready(moe_reference(x, params))

    assert out.shape == (BATCH, SEQ_LEN, HIDDEN_DIM)
    assert out.dtype == x.dtype
    max_err = float(jnp.max(jnp.abs(out - ref)))
    assert jnp.allclose(out, ref, rtol=1e-2, atol=3e-4), max_err

    print("KERNEL_OK")
</pallas_src>

<mosaic_0001>
module attributes {stable_mosaic.version = 11 : i64} {
  func.func @moe_fused_kernel(%arg0: i32, %arg1: memref<16x128xbf16, #tpu.memory_space<vmem>>, %arg2: memref<16x2304xf32, #tpu.memory_space<vmem>>, %arg3: memref<128x4608xbf16, #tpu.memory_space<vmem>>, %arg4: memref<2304x128xbf16, #tpu.memory_space<vmem>>, %arg5: memref<16x128xf32, #tpu.memory_space<vmem>>) attributes {dimension_semantics = [#tpu.dimension_semantics<parallel>], iteration_bounds = array<i64: 1>, scalar_prefetch = 0 : i64, scratch_operands = 0 : i64, tpu.core_type = #tpu.core_type<tc>, window_params = [{transform_indices = @transform_0, window_bounds = array<i64: 16, 128>}, {transform_indices = @transform_1, window_bounds = array<i64: 16, 2304>}, {pipeline_mode = #tpu.pipeline_mode<synchronous>, transform_indices = @transform_2, window_bounds = array<i64: 128, 4608>}, {pipeline_mode = #tpu.pipeline_mode<synchronous>, transform_indices = @transform_3, window_bounds = array<i64: 2304, 128>}, {transform_indices = @transform_4, window_bounds = array<i64: 16, 128>}]} {
    %c0 = arith.constant 0 : index
    %c0_0 = arith.constant 0 : index
    %0 = vector.load %arg1[%c0, %c0_0] : memref<16x128xbf16, #tpu.memory_space<vmem>>, vector<16x128xbf16>
    %c0_1 = arith.constant 0 : index
    %c0_2 = arith.constant 0 : index
    %1 = vector.load %arg3[%c0_1, %c0_2] : memref<128x4608xbf16, #tpu.memory_space<vmem>>, vector<128x4608xbf16>
    %cst = arith.constant dense<0.000000e+00> : vector<16x4608xf32>
    %2 = tpu.matmul %0, %1, %cst {dimension_numbers = #tpu.dot_dimension_numbers<[1], [0], [0], [1], [0, 0, 1, 1], [], []>} : vector<16x128xbf16>, vector<128x4608xbf16>, vector<16x4608xf32> -> vector<16x4608xf32>
    %3 = vector.extract_strided_slice %2 {offsets = [0, 0], sizes = [16, 2304], strides = [1, 1]} : vector<16x4608xf32> to vector<16x2304xf32>
    %4 = vector.extract_strided_slice %2 {offsets = [0, 2304], sizes = [16, 2304], strides = [1, 1]} : vector<16x4608xf32> to vector<16x2304xf32>
    %5 = arith.negf %3 : vector<16x2304xf32>
    %6 = math.exp %5 : vector<16x2304xf32>
    %cst_3 = arith.constant 1.000000e+00 : f32
    %7 = vector.broadcast %cst_3 : f32 to vector<16x2304xf32>
    %8 = arith.addf %7, %6 : vector<16x2304xf32>
    %9 = arith.divf %7, %8 : vector<16x2304xf32>
    %10 = arith.mulf %3, %9 : vector<16x2304xf32>
    %11 = arith.mulf %10, %4 : vector<16x2304xf32>
    %c0_4 = arith.constant 0 : index
    %c0_5 = arith.constant 0 : index
    %12 = vector.load %arg2[%c0_4, %c0_5] : memref<16x2304xf32, #tpu.memory_space<vmem>>, vector<16x2304xf32>
    %13 = arith.mulf %11, %12 : vector<16x2304xf32>
    %14 = arith.truncf %13 : vector<16x2304xf32> to vector<16x2304xbf16>
    %c0_6 = arith.constant 0 : index
    %c0_7 = arith.constant 0 : index
    %15 = vector.load %arg4[%c0_6, %c0_7] : memref<2304x128xbf16, #tpu.memory_space<vmem>>, vector<2304x128xbf16>
    %cst_8 = arith.constant dense<0.000000e+00> : vector<16x128xf32>
    %16 = tpu.matmul %14, %15, %cst_8 {dimension_numbers = #tpu.dot_dimension_numbers<[1], [0], [0], [1], [0, 0, 1, 1], [], []>} : vector<16x2304xbf16>, vector<2304x128xbf16>, vector<16x128xf32> -> vector<16x128xf32>
    %c0_9 = arith.constant 0 : index
    %c0_10 = arith.constant 0 : index
    %17 = vector.load %arg5[%c0_9, %c0_10] : memref<16x128xf32, #tpu.memory_space<vmem>>, vector<16x128xf32>
    tpu.vector_store %arg5[%c0_9, %c0_10], %16 {strides = array<i32>} : memref<16x128xf32, #tpu.memory_space<vmem>>, vector<16x128xf32>,
    return
  }
  func.func @transform_0(%arg0: i32) -> (i32, i32) {
    %c0_i32 = arith.constant 0 : i32
    %c0_i32_0 = arith.constant 0 : i32
    return %arg0, %c0_i32 : i32, i32
  }
  func.func @transform_1(%arg0: i32) -> (i32, i32) {
    %c0_i32 = arith.constant 0 : i32
    %c0_i32_0 = arith.constant 0 : i32
    return %arg0, %c0_i32 : i32, i32
  }
  func.func @transform_2(%arg0: i32) -> (i32, i32) {
    %c0_i32 = arith.constant 0 : i32
    %c0_i32_0 = arith.constant 0 : i32
    %c0_i32_1 = arith.constant 0 : i32
    return %c0_i32, %c0_i32_0 : i32, i32
  }
  func.func @transform_3(%arg0: i32) -> (i32, i32) {
    %c0_i32 = arith.constant 0 : i32
    %c0_i32_0 = arith.constant 0 : i32
    %c0_i32_1 = arith.constant 0 : i32
    return %c0_i32, %c0_i32_0 : i32, i32
  }
  func.func @transform_4(%arg0: i32) -> (i32, i32) {
    %c0_i32 = arith.constant 0 : i32
    %c0_i32_0 = arith.constant 0 : i32
    return %arg0, %c0_i32 : i32, i32
  }
}

</mosaic_0001>

<bundles_post_ra>
// kernel: moe_forward.1
= control target key start
LH: loop header
LB: loop body
LE: loop exit
PB: predicated region body
PF: predicated region fallthrough
CT: control target
= control target key end

     0   :  { %9 = vsyncpa [#allocation3], 0  ;;  %s5865_s15 = smov [#allocation2]   ;;  %s6642_s0 = inlined_call_operand.vmem [shape: bf16[16,128], index: 0, kind: input, shape index: {}]   ;;  %s6643_s1 = inlined_call_operand.vmem [shape: f32[16,2304], index: 1, kind: input, shape index: {}]   ;;  %s6644_s2 = inlined_call_operand.hbm [shape: bf16[128,4608], index: 2, kind: input, shape index: {}]   ;;  %s6645_s3 = inlined_call_operand.vmem [shape: bf16[2304,128], index: 3, kind: input, shape index: {}]   ;;  %s6646_s4 = inlined_call_operand.vmem [shape: f32[16,128], index: 4, kind: output, shape index: {}]  }
   0x1   :  { %s19_s16 = sshll.u32 %s5865_s15, 4  ;;  %s5841_s19 = scalar_lea.hbm %s6644_s2, 36864  ;;  %s20_s16 = int_to_ptr.vmem [resolvable:$true] %s19_s16 }
   0x2   :  { %p5842_p0 = scmp.ne.s32.totalorder %s6644_s2, %s5841_s19  ;;  %p5845_p1 = scmp.lt.u32.totalorder %s5841_s19, %s6644_s2 }
   0x4   :  { %p5847_p2 = pnand %p5845_p1, %p5842_p0 }
   0x6   :  { %5850 = shalt.err (!%p5847_p2)
}
   0x7   :  { %s5851_s24 = scalar_lea.vmem %s20_s16, 36864  ;;  %p5856_p4 = scmp.lt.s32.totalorder %s20_s16, %s20_s16 }
   0x8   :  { %p5852_p3 = scmp.ne.s32.totalorder %s20_s16, %s5851_s24  ;;  %p5857_p5 = scmp.lt.s32.totalorder %s5851_s24, %s5851_s24 }
   0xa   :  { %p5858_p6 = por %p5857_p5, %p5856_p4 }
   0xc   :  { %p5859_p7 = pnand %p5858_p6, %p5852_p3 }
   0xe   :  { %5862 = shalt.err (!%p5859_p7)
}
   0xf   :  { %s5866_s25 = smov 2304   ;;  %s5867_s26 = smov 144  }
  0x10   :  { %25 = dma.hbm_to_vmem [thread:$0]  %s6644_s2, 36864, %s20_s16, [#allocation3], %s5866_s25, %s5866_s25, %s5867_s26  }
  0x11   :  { %5863 = dma.done.wait [#allocation3], 36864  }
  0x12   :  { %5864 = vsyncadd [#allocation3], 4294930432  ;;  %v5868_v0 = vmov 0   ;;  %v5119_v1 = vld [vmem:[#allocation2 + $0x4] ss:$144 sps:$4 sm:$0xff]   ;;  %v5911_v35 = vld [vmem:[%s6642_s0] sm:$0xff]  }
  0x13   :  { %1800 = vmatprep.mubr.bf16.mxu0 %v5868_v0  ;;  %1843 = vmatprep.mubr.bf16.mxu1 %v5868_v0  ;;  %v5121_v2 = vld [vmem:[#allocation2 + $0xc] ss:$144 sps:$4 sm:$0xff]   ;;  %v5123_v3 = vld [vmem:[#allocation2] ss:$144 sps:$4 sm:$0xff]   ;;  %v5124_v4 = vld [vmem:[#allocation2 + $0x8] ss:$144 sps:$4 sm:$0xff]  }
  0x14   :  { %1768 = vmatprep.subr.bf16.mxu0 %v5119_v1  ;;  %1811 = vmatprep.subr.bf16.mxu1 %v5121_v2  ;;  %v5125_v5 = vld [vmem:[#allocation2 + $0x124] ss:$144 sps:$4 sm:$0xff]   ;;  %v5127_v6 = vld [vmem:[#allocation2 + $0x12c] ss:$144 sps:$4 sm:$0xff]   ;;  %v5129_v7 = vld [vmem:[#allocation2 + $0x120] ss:$144 sps:$4 sm:$0xff]  }
  0x15   :  { %1769 = vmatpush1.bf16.msra.mxu0 %v5123_v3  ;;  %1812 = vmatpush1.bf16.msra.mxu1 %v5124_v4  ;;  %v5130_v8 = vld [vmem:[#allocation2 + $0x128] ss:$144 sps:$4 sm:$0xff]   ;;  %v5131_v9 = vld [vmem:[#allocation2 + $0x244] ss:$144 sps:$4 sm:$0xff]   ;;  %v5133_v10 = vld [vmem:[#allocation2 + $0x24c] ss:$144 sps:$4 sm:$0xff]  }
  0x16   :  { %1770 = vmatprep.subr.bf16.mxu0 %v5125_v5  ;;  %1813 = vmatprep.subr.bf16.mxu1 %v5127_v6  ;;  %v5135_v11 = vld [vmem:[#allocation2 + $0x240] ss:$144 sps:$4 sm:$0xff]   ;;  %v5136_v12 = vld [vmem:[#allocation2 + $0x248] ss:$144 sps:$4 sm:$0xff]   ;;  %v5137_v13 = vld [vmem:[#allocation2 + $0x364] ss:$144 sps:$4 sm:$0xff]  }
  0x17   :  { %v5139_v14 = vld [vmem:[#allocation2 + $0x36c] ss:$144 sps:$4 sm:$0xff]   ;;  %v5141_v15 = vld [vmem:[#allocation2 + $0x360] ss:$144 sps:$4 sm:$0xff]   ;;  %v5142_v16 = vld [vmem:[#allocation2 + $0x368] ss:$144 sps:$4 sm:$0xff]  }
  0x18   :  { %v5143_v17 = vld [vmem:[#allocation2 + $0x484] ss:$144 sps:$4 sm:$0xff]   ;;  %v5145_v18 = vld [vmem:[#allocation2 + $0x48c] ss:$144 sps:$4 sm:$0xff]   ;;  %v5147_v19 = vld [vmem:[#allocation2 + $0x480] ss:$144 sps:$4 sm:$0xff]  }
  0x19   :  { %1771 = vmatpush1.bf16.msra.mxu0 %v5129_v7  ;;  %1814 = vmatpush1.bf16.msra.mxu1 %v5130_v8  ;;  %v5148_v20 = vld [vmem:[#allocation2 + $0x488] ss:$144 sps:$4 sm:$0xff]   ;;  %v5149_v21 = vld [vmem:[#allocation2 + $0x5a4] ss:$144 sps:$4 sm:$0xff]   ;;  %v5151_v22 = vld [vmem:[#allocation2 + $0x5ac] ss:$144 sps:$4 sm:$0xff]  }
  0x1a   :  { %1772 = vmatprep.subr.bf16.mxu0 %v5131_v9  ;;  %1815 = vmatprep.subr.bf16.mxu1 %v5133_v10  ;;  %v5153_v23 = vld [vmem:[#allocation2 + $0x5a0] ss:$144 sps:$4 sm:$0xff]   ;;  %v5154_v24 = vld [vmem:[#allocation2 + $0x5a8] ss:$144 sps:$4 sm:$0xff]   ;;  %v5155_v25 = vld [vmem:[#allocation2 + $0x6c4] ss:$144 sps:$4 sm:$0xff]  }
  0x1b   :  { %v5157_v26 = vld [vmem:[#allocation2 + $0x6cc] ss:$144 sps:$4 sm:$0xff]   ;;  %v5159_v27 = vld [vmem:[#allocation2 + $0x6c0] ss:$144 sps:$4 sm:$0xff]   ;;  %v5160_v28 = vld [vmem:[#allocation2 + $0x6c8] ss:$144 sps:$4 sm:$0xff]  }
  0x1c   :  { %v5161_v29 = vld [vmem:[#allocation2 + $0x7e4] ss:$144 sps:$4 sm:$0xff]   ;;  %v5163_v30 = vld [vmem:[#allocation2 + $0x7ec] ss:$144 sps:$4 sm:$0xff]   ;;  %v5165_v31 = vld [vmem:[#allocation2 + $0x7e0] ss:$144 sps:$4 sm:$0xff]  }
  0x1d   :  { %1773 = vmatpush1.bf16.msra.mxu0 %v5135_v11  ;;  %1816 = vmatpush1.bf16.msra.mxu1 %v5136_v12  ;;  %v5166_v32 = vld [vmem:[#allocation2 + $0x7e8] ss:$144 sps:$4 sm:$0xff]   ;;  %v5170_v33 = vld [vmem:[#allocation2 + $0x14] ss:$144 sps:$4 sm:$0xff]   ;;  %v5173_v34 = vld [vmem:[#allocation2 + $0x1c] ss:$144 sps:$4 sm:$0xff]  }
  0x1e   :  { %1774 = vmatprep.subr.bf16.mxu0 %v5137_v13  ;;  %1817 = vmatprep.subr.bf16.mxu1 %v5139_v14  ;;  %v5168_v36 = vld [vmem:[#allocation2 + $0x10] ss:$144 sps:$4 sm:$0xff]   ;;  %v5171_v37 = vld [vmem:[#allocation2 + $0x18] ss:$144 sps:$4 sm:$0xff]   ;;  %v5176_v38 = vld [vmem:[#allocation2 + $0x134] ss:$144 sps:$4 sm:$0xff]  }
  0x1f   :  { %v5179_v39 = vld [vmem:[#allocation2 + $0x13c] ss:$144 sps:$4 sm:$0xff]   ;;  %v5174_v40 = vld [vmem:[#allocation2 + $0x130] ss:$144 sps:$4 sm:$0xff]   ;;  %v5177_v41 = vld [vmem:[#allocation2 + $0x138] ss:$144 sps:$4 sm:$0xff]  }
  0x20   :  { %v5182_v42 = vld [vmem:[#allocation2 + $0x254] ss:$144 sps:$4 sm:$0xff]   ;;  %v5185_v43 = vld [vmem:[#allocation2 + $0x25c] ss:$144 sps:$4 sm:$0xff]   ;;  %v5180_v44 = vld [vmem:[#allocation2 + $0x250] ss:$144 sps:$4 sm:$0xff]  }
  0x21   :  { %1775 = vmatpush1.bf16.msra.mxu0 %v5141_v15  ;;  %1818 = vmatpush1.bf16.msra.mxu1 %v5142_v16  ;;  %v5183_v45 = vld [vmem:[#allocation2 + $0x258] ss:$144 sps:$4 sm:$0xff]   ;;  %v5188_v46 = vld [vmem:[#allocation2 + $0x374] ss:$144 sps:$4 sm:$0xff]   ;;  %v5191_v47 = vld [vmem:[#allocation2 + $0x37c] ss:$144 sps:$4 sm:$0xff]  }
  0x22   :  { %1776 = vmatprep.subr.bf16.mxu0 %v5143_v17  ;;  %1819 = vmatprep.subr.bf16.mxu1 %v5145_v18  ;;  %v5186_v48 = vld [vmem:[#allocation2 + $0x370] ss:$144 sps:$4 sm:$0xff]   ;;  %v5189_v49 = vld [vmem:[#allocation2 + $0x378] ss:$144 sps:$4 sm:$0xff]   ;;  %v5194_v50 = vld [vmem:[#allocation2 + $0x494] ss:$144 sps:$4 sm:$0xff]  }
  0x23   :  { %v5197_v51 = vld [vmem:[#allocation2 + $0x49c] ss:$144 sps:$4 sm:$0xff]   ;;  %v5192_v52 = vld [vmem:[#allocation2 + $0x490] ss:$144 sps:$4 sm:$0xff]   ;;  %v5195_v53 = vld [vmem:[#allocation2 + $0x498] ss:$144 sps:$4 sm:$0xff]  }
  0x24   :  { %v5200_v54 = vld [vmem:[#allocation2 + $0x5b4] ss:$144 sps:$4 sm:$0xff]   ;;  %v5203_v55 = vld [vmem:[#allocation2 + $0x5bc] ss:$144 sps:$4 sm:$0xff]   ;;  %v5198_v56 = vld [vmem:[#allocation2 + $0x5b0] ss:$144 sps:$4 sm:$0xff]  }
  0x25   :  { %1777 = vmatpush1.bf16.msra.mxu0 %v5147_v19  ;;  %1820 = vmatpush1.bf16.msra.mxu1 %v5148_v20  ;;  %v5201_v57 = vld [vmem:[#allocation2 + $0x5b8] ss:$144 sps:$4 sm:$0xff]   ;;  %v5206_v58 = vld [vmem:[#allocation2 + $0x6d4] ss:$144 sps:$4 sm:$0xff]   ;;  %v5209_v59 = vld [vmem:[#allocation2 + $0x6dc] ss:$144 sps:$4 sm:$0xff]  }
  0x26   :  { %1778 = vmatprep.subr.bf16.mxu0 %v5149_v21  ;;  %1821 = vmatprep.subr.bf16.mxu1 %v5151_v22  ;;  %v5204_v60 = vld [vmem:[#allocation2 + $0x6d0] ss:$144 sps:$4 sm:$0xff]   ;;  %v5207_v61 = vld [vmem:[#allocation2 + $0x6d8] ss:$144 sps:$4 sm:$0xff]   ;;  %v5212_v62 = vld [vmem:[#allocation2 + $0x7f4] ss:$144 sps:$4 sm:$0xff]  }
  0x27   :  { %v5215_v63 = vld [vmem:[#allocation2 + $0x7fc] ss:$144 sps:$4 sm:$0xff]   ;;  %v5210_v1 = vld [vmem:[#allocation2 + $0x7f0] ss:$144 sps:$4 sm:$0xff]   ;;  %v5213_v2 = vld [vmem:[#allocation2 + $0x7f8] ss:$144 sps:$4 sm:$0xff]  }
  0x28   :  { %v5218_v3 = vld [vmem:[#allocation2 + $0x24] ss:$144 sps:$4 sm:$0xff]   ;;  %v5221_v4 = vld [vmem:[#allocation2 + $0x2c] ss:$144 sps:$4 sm:$0xff]   ;;  %v5216_v5 = vld [vmem:[#allocation2 + $0x20] ss:$144 sps:$4 sm:$0xff]  }
  0x29   :  { %1779 = vmatpush1.bf16.msra.mxu0 %v5153_v23  ;;  %1822 = vmatpush1.bf16.msra.mxu1 %v5154_v24  ;;  %v5219_v6 = vld [vmem:[#allocation2 + $0x28] ss:$144 sps:$4 sm:$0xff]   ;;  %v5224_v7 = vld [vmem:[#allocation2 + $0x144] ss:$144 sps:$4 sm:$0xff]   ;;  %v5227_v8 = vld [vmem:[#allocation2 + $0x14c] ss:$144 sps:$4 sm:$0xff]  }
  0x2a   :  { %1780 = vmatprep.subr.bf16.mxu0 %v5155_v25  ;;  %1823 = vmatprep.subr.bf16.mxu1 %v5157_v26  ;;  %v5222_v9 = vld [vmem:[#allocation2 + $0x140] ss:$144 sps:$4 sm:$0xff]   ;;  %v5225_v10 = vld [vmem:[#allocation2 + $0x148] ss:$144 sps:$4 sm:$0xff]   ;;  %v5230_v11 = vld [vmem:[#allocation2 + $0x264] ss:$144 sps:$4 sm:$0xff]  }
  0x2b   :  { %v5233_v12 = vld [vmem:[#allocation2 + $0x26c] ss:$144 sps:$4 sm:$0xff]   ;;  %v5228_v13 = vld [vmem:[#allocation2 + $0x260] ss:$144 sps:$4 sm:$0xff]   ;;  %v5231_v14 = vld [vmem:[#allocation2 + $0x268] ss:$144 sps:$4 sm:$0xff]  }
  0x2c   :  { %v5236_v15 = vld [vmem:[#allocation2 + $0x384] ss:$144 sps:$4 sm:$0xff]   ;;  %v5239_v16 = vld [vmem:[#allocation2 + $0x38c] ss:$144 sps:$4 sm:$0xff]   ;;  %v5234_v17 = vld [vmem:[#allocation2 + $0x380] ss:$144 sps:$4 sm:$0xff]  }
  0x2d   :  { %1781 = vmatpush1.bf16.msra.mxu0 %v5159_v27  ;;  %1824 = vmatpush1.bf16.msra.mxu1 %v5160_v28  ;;  %v5237_v18 = vld [vmem:[#allocation2 + $0x388] ss:$144 sps:$4 sm:$0xff]   ;;  %v5242_v19 = vld [vmem:[#allocation2 + $0x4a4] ss:$144 sps:$4 sm:$0xff]   ;;  %v5245_v20 = vld [vmem:[#allocation2 + $0x4ac] ss:$144 sps:$4 sm:$0xff]  }
  0x2e   :  { %1782 = vmatprep.subr.bf16.mxu0 %v5161_v29  ;;  %1825 = vmatprep.subr.bf16.mxu1 %v5163_v30  ;;  %v5240_v21 = vld [vmem:[#allocation2 + $0x4a0] ss:$144 sps:$4 sm:$0xff]   ;;  %v5243_v22 = vld [vmem:[#allocation2 + $0x4a8] ss:$144 sps:$4 sm:$0xff]   ;;  %v5248_v23 = vld [vmem:[#allocation2 + $0x5c4] ss:$144 sps:$4 sm:$0xff]  }
  0x2f   :  { %v5251_v24 = vld [vmem:[#allocation2 + $0x5cc] ss:$144 sps:$4 sm:$0xff]   ;;  %v5246_v25 = vld [vmem:[#allocation2 + $0x5c0] ss:$144 sps:$4 sm:$0xff]   ;;  %v5249_v26 = vld [vmem:[#allocation2 + $0x5c8] ss:$144 sps:$4 sm:$0xff]  }
  0x30   :  { %v5254_v27 = vld [vmem:[#allocation2 + $0x6e4] ss:$144 sps:$4 sm:$0xff]   ;;  %v5257_v28 = vld [vmem:[#allocation2 + $0x6ec] ss:$144 sps:$4 sm:$0xff]   ;;  %v5252_v29 = vld [vmem:[#allocation2 + $0x6e0] ss:$144 sps:$4 sm:$0xff]  }
  0x31   :  { %1783 = vmatpush1.bf16.msra.mxu0 %v5165_v31  ;;  %1826 = vmatpush1.bf16.msra.mxu1 %v5166_v32  ;;  %v5255_v30 = vld [vmem:[#allocation2 + $0x6e8] ss:$144 sps:$4 sm:$0xff]   ;;  %v5260_v31 = vld [vmem:[#allocation2 + $0x804] ss:$144 sps:$4 sm:$0xff]   ;;  %v5263_v32 = vld [vmem:[#allocation2 + $0x80c] ss:$144 sps:$4 sm:$0xff]  }
  0x32   :  { %1854 = vmatprep.subr.bf16.mxu0 %v5170_v33  ;;  %1897 = vmatprep.subr.bf16.mxu1 %v5173_v34  ;;  %v5258_v33 = vld [vmem:[#allocation2 + $0x800] ss:$144 sps:$4 sm:$0xff]   ;;  %v5261_v34 = vld [vmem:[#allocation2 + $0x808] ss:$144 sps:$4 sm:$0xff]  }
  0x34   :  { %1801 = vmatmul.mubr.bf16.vlgmr.msra.gmra.mrb[0].mxu0 %v5911_v35  ;;  %1844 = vmatmul.mubr.bf16.vlgmr.msra.gmra.mrb[0].mxu1 %v5911_v35 }
  0x35   :  { %1855 = vmatpush1.bf16.msra.mxu0 %v5168_v36  ;;  %1898 = vmatpush1.bf16.msra.mxu1 %v5171_v37  ;;  %v5266_v36 = vld [vmem:[#allocation2 + $0x34] ss:$144 sps:$4 sm:$0xff]   ;;  %v5269_v37 = vld [vmem:[#allocation2 + $0x3c] ss:$144 sps:$4 sm:$0xff]  }
  0x36   :  { %1856 = vmatprep.subr.bf16.mxu0 %v5176_v38  ;;  %1899 = vmatprep.subr.bf16.mxu1 %v5179_v39  ;;  %v5264_v38 = vld [vmem:[#allocation2 + $0x30] ss:$144 sps:$4 sm:$0xff]   ;;  %v5267_v39 = vld [vmem:[#allocation2 + $0x38] ss:$144 sps:$4 sm:$0xff]  }
  0x37   :  { %1886 = vmatprep.mubr.bf16.mxu0 %v5868_v0  ;;  %1929 = vmatprep.mubr.bf16.mxu1 %v5868_v0 }
  0x39   :  { %1857 = vmatpush1.bf16.msra.mxu0 %v5174_v40  ;;  %1900 = vmatpush1.bf16.msra.mxu1 %v5177_v41  ;;  %v5272_v40 = vld [vmem:[#allocation2 + $0x154] ss:$144 sps:$4 sm:$0xff]   ;;  %v5275_v41 = vld [vmem:[#allocation2 + $0x15c] ss:$144 sps:$4 sm:$0xff]  }
  0x3a   :  { %1858 = vmatprep.subr.bf16.mxu0 %v5182_v42  ;;  %1901 = vmatprep.subr.bf16.mxu1 %v5185_v43  ;;  %v5270_v42 = vld [vmem:[#allocation2 + $0x150] ss:$144 sps:$4 sm:$0xff]   ;;  %v5273_v43 = vld [vmem:[#allocation2 + $0x158] ss:$144 sps:$4 sm:$0xff]  }
  0x3d   :  { %1859 = vmatpush1.bf16.msra.mxu0 %v5180_v44  ;;  %1902 = vmatpush1.bf16.msra.mxu1 %v5183_v45  ;;  %v5278_v44 = vld [vmem:[#allocation2 + $0x274] ss:$144 sps:$4 sm:$0xff]   ;;  %v5281_v45 = vld [vmem:[#allocation2 + $0x27c] ss:$144 sps:$4 sm:$0xff]  }
  0x3e   :  { %1860 = vmatprep.subr.bf16.mxu0 %v5188_v46  ;;  %1903 = vmatprep.subr.bf16.mxu1 %v5191_v47  ;;  %v5276_v46 = vld [vmem:[#allocation2 + $0x270] ss:$144 sps:$4 sm:$0xff]   ;;  %v5279_v47 = vld [vmem:[#allocation2 + $0x278] ss:$144 sps:$4 sm:$0xff]  }
  0x41   :  { %1861 = vmatpush1.bf16.msra.mxu0 %v5186_v48  ;;  %1904 = vmatpush1.bf16.msra.mxu1 %v5189_v49  ;;  %v5284_v48 = vld [vmem:[#allocation2 + $0x394] ss:$144 sps:$4 sm:$0xff]   ;;  %v5287_v49 = vld [vmem:[#allocation2 + $0x39c] ss:$144 sps:$4 sm:$0xff]  }
  0x42   :  { %1862 = vmatprep.subr.bf16.mxu0 %v5194_v50  ;;  %1905 = vmatprep.subr.bf16.mxu1 %v5197_v51  ;;  %v5282_v50 = vld [vmem:[#allocation2 + $0x390] ss:$144 sps:$4 sm:$0xff]   ;;  %v5285_v51 = vld [vmem:[#allocation2 + $0x398] ss:$144 sps:$4 sm:$0xff]  }
  0x45   :  { %1863 = vmatpush1.bf16.msra.mxu0 %v5192_v52  ;;  %1906 = vmatpush1.bf16.msra.mxu1 %v5195_v53  ;;  %v5290_v52 = vld [vmem:[#allocation2 + $0x4b4] ss:$144 sps:$4 sm:$0xff]   ;;  %v5293_v53 = vld [vmem:[#allocation2 + $0x4bc] ss:$144 sps:$4 sm:$0xff]  }
  0x46   :  { %1864 = vmatprep.subr.bf16.mxu0 %v5200_v54  ;;  %1907 = vmatprep.subr.bf16.mxu1 %v5203_v55  ;;  %v5288_v54 = vld [vmem:[#allocation2 + $0x4b0] ss:$144 sps:$4 sm:$0xff]   ;;  %v5291_v55 = vld [vmem:[#allocation2 + $0x4b8] ss:$144 sps:$4 sm:$0xff]  }
  0x49   :  { %1865 = vmatpush1.bf16.msra.mxu0 %v5198_v56  ;;  %1908 = vmatpush1.bf16.msra.mxu1 %v5201_v57  ;;  %v5296_v56 = vld [vmem:[#allocation2 + $0x5d4] ss:$144 sps:$4 sm:$0xff]   ;;  %v5299_v57 = vld [vmem:[#allocation2 + $0x5dc] ss:$144 sps:$4 sm:$0xff]  }
  0x4a   :  { %1866 = vmatprep.subr.bf16.mxu0 %v5206_v58  ;;  %1909 = vmatprep.subr.bf16.mxu1 %v5209_v59  ;;  %v5294_v58 = vld [vmem:[#allocation2 + $0x5d0] ss:$144 sps:$4 sm:$0xff]   ;;  %v5297_v59 = vld [vmem:[#allocation2 + $0x5d8] ss:$144 sps:$4 sm:$0xff]  }
  0x4d   :  { %1867 = vmatpush1.bf16.msra.mxu0 %v5204_v60  ;;  %1910 = vmatpush1.bf16.msra.mxu1 %v5207_v61  ;;  %v5302_v60 = vld [vmem:[#allocation2 + $0x6f4] ss:$144 sps:$4 sm:$0xff]   ;;  %v5305_v61 = vld [vmem:[#allocation2 + $0x6fc] ss:$144 sps:$4 sm:$0xff]  }
  0x4e   :  { %1868 = vmatprep.subr.bf16.mxu0 %v5212_v62  ;;  %1911 = vmatprep.subr.bf16.mxu1 %v5215_v63  ;;  %v5300_v62 = vld [vmem:[#allocation2 + $0x6f0] ss:$144 sps:$4 sm:$0xff]   ;;  %v5303_v63 = vld [vmem:[#allocation2 + $0x6f8] ss:$144 sps:$4 sm:$0xff]  }
  0x51   :  { %1869 = vmatpush1.bf16.msra.mxu0 %v5210_v1  ;;  %1912 = vmatpush1.bf16.msra.mxu1 %v5213_v2  ;;  %v5308_v1 = vld [vmem:[#allocation2 + $0x814] ss:$144 sps:$4 sm:$0xff]   ;;  %v5311_v2 = vld [vmem:[#allocation2 + $0x81c] ss:$144 sps:$4 sm:$0xff]  }
  0x52   :  { %1940 = vmatprep.subr.bf16.mxu0 %v5218_v3  ;;  %1983 = vmatprep.subr.bf16.mxu1 %v5221_v4  ;;  %v5306_v3 = vld [vmem:[#allocation2 + $0x810] ss:$144 sps:$4 sm:$0xff]   ;;  %v5309_v4 = vld [vmem:[#allocation2 + $0x818] ss:$144 sps:$4 sm:$0xff]  }
  0x54   :  { %1887 = vmatmul.mubr.bf16.vlgmr.msra.gmra.mrb[4].mxu0 %v5911_v35  ;;  %1930 = vmatmul.mubr.bf16.vlgmr.msra.gmra.mrb[4].mxu1 %v5911_v35 }
  0x55   :  { %1941 = vmatpush1.bf16.msra.mxu0 %v5216_v5  ;;  %1984 = vmatpush1.bf16.msra.mxu1 %v5219_v6  ;;  %v5314_v5 = vld [vmem:[#allocation2 + $0x44] ss:$144 sps:$4 sm:$0xff]   ;;  %v5317_v6 = vld [vmem:[#allocation2 + $0x4c] ss:$144 sps:$4 sm:$0xff]  }
  0x56   :  { %1942 = vmatprep.subr.bf16.mxu0 %v5224_v7  ;;  %1985 = vmatprep.subr.bf16.mxu1 %v5227_v8  ;;  %v5312_v7 = vld [vmem:[#allocation2 + $0x40] ss:$144 sps:$4 sm:$0xff]   ;;  %v5315_v8 = vld [vmem:[#allocation2 + $0x48] ss:$144 sps:$4 sm:$0xff]  }
  0x57   :  { %1972 = vmatprep.mubr.bf16.mxu0 %v5868_v0  ;;  %2015 = vmatprep.mubr.bf16.mxu1 %v5868_v0 }
  0x59   :  { %1943 = vmatpush1.bf16.msra.mxu0 %v5222_v9  ;;  %1986 = vmatpush1.bf16.msra.mxu1 %v5225_v10  ;;  %v5320_v9 = vld [vmem:[#allocation2 + $0x164] ss:$144 sps:$4 sm:$0xff]   ;;  %v5323_v10 = vld [vmem:[#allocation2 + $0x16c] ss:$144 sps:$4 sm:$0xff]  }
  0x5a   :  { %1944 = vmatprep.subr.bf16.mxu0 %v5230_v11  ;;  %1987 = vmatprep.subr.bf16.mxu1 %v5233_v12  ;;  %v5318_v11 = vld [vmem:[#allocation2 + $0x160] ss:$144 sps:$4 sm:$0xff]   ;;  %v5321_v12 = vld [vmem:[#allocation2 + $0x168] ss:$144 sps:$4 sm:$0xff]  }
  0x5d   :  { %1945 = vmatpush1.bf16.msra.mxu0 %v5228_v13  ;;  %1988 = vmatpush1.bf16.msra.mxu1 %v5231_v14  ;;  %v5326_v13 = vld [vmem:[#allocation2 + $0x284] ss:$144 sps:$4 sm:$0xff]   ;;  %v5329_v14 = vld [vmem:[#allocation2 + $0x28c] ss:$144 sps:$4 sm:$0xff]  }
  0x5e   :  { %1946 = vmatprep.subr.bf16.mxu0 %v5236_v15  ;;  %1989 = vmatprep.subr.bf16.mxu1 %v5239_v16  ;;  %v5324_v15 = vld [vmem:[#allocation2 + $0x280] ss:$144 sps:$4 sm:$0xff]   ;;  %v5327_v16 = vld [vmem:[#allocation2 + $0x288] ss:$144 sps:$4 sm:$0xff]  }
  0x61   :  { %1947 = vmatpush1.bf16.msra.mxu0 %v5234_v17  ;;  %1990 = vmatpush1.bf16.msra.mxu1 %v5237_v18  ;;  %v5332_v17 = vld [vmem:[#allocation2 + $0x3a4] ss:$144 sps:$4 sm:$0xff]   ;;  %v5335_v18 = vld [vmem:[#allocation2 + $0x3ac] ss:$144 sps:$4 sm:$0xff]  }
  0x62   :  { %1948 = vmatprep.subr.bf16.mxu0 %v5242_v19  ;;  %1991 = vmatprep.subr.bf16.mxu1 %v5245_v20  ;;  %v5330_v19 = vld [vmem:[#allocation2 + $0x3a0] ss:$144 sps:$4 sm:$0xff]   ;;  %v5333_v20 = vld [vmem:[#allocation2 + $0x3a8] ss:$144 sps:$4 sm:$0xff]  }
  0x65   :  { %1949 = vmatpush1.bf16.msra.mxu0 %v5240_v21  ;;  %1992 = vmatpush1.bf16.msra.mxu1 %v5243_v22  ;;  %v5338_v21 = vld [vmem:[#allocation2 + $0x4c4] ss:$144 sps:$4 sm:$0xff]   ;;  %v5341_v22 = vld [vmem:[#allocation2 + $0x4cc] ss:$144 sps:$4 sm:$0xff]  }
  0x66   :  { %1950 = vmatprep.subr.bf16.mxu0 %v5248_v23  ;;  %1993 = vmatprep.subr.bf16.mxu1 %v5251_v24  ;;  %v5336_v23 = vld [vmem:[#allocation2 + $0x4c0] ss:$144 sps:$4 sm:$0xff]   ;;  %v5339_v24 = vld [vmem:[#allocation2 + $0x4c8] ss:$144 sps:$4 sm:$0xff]  }
  0x69   :  { %1951 = vmatpush1.bf16.msra.mxu0 %v5246_v25  ;;  %1994 = vmatpush1.bf16.msra.mxu1 %v5249_v26  ;;  %v5344_v25 = vld [vmem:[#allocation2 + $0x5e4] ss:$144 sps:$4 sm:$0xff]   ;;  %v5347_v26 = vld [vmem:[#allocation2 + $0x5ec] ss:$144 sps:$4 sm:$0xff]  }
  0x6a   :  { %1952 = vmatprep.subr.bf16.mxu0 %v5254_v27  ;;  %1995 = vmatprep.subr.bf16.mxu1 %v5257_v28  ;;  %v5342_v27 = vld [vmem:[#allocation2 + $0x5e0] ss:$144 sps:$4 sm:$0xff]   ;;  %v5345_v28 = vld [vmem:[#allocation2 + $0x5e8] ss:$144 sps:$4 sm:$0xff]  }
  0x6d   :  { %1953 = vmatpush1.bf16.msra.mxu0 %v5252_v29  ;;  %1996 = vmatpush1.bf16.msra.mxu1 %v5255_v30  ;;  %v5350_v29 = vld [vmem:[#allocation2 + $0x704] ss:$144 sps:$4 sm:$0xff]   ;;  %v5353_v30 = vld [vmem:[#allocation2 + $0x70c] ss:$144 sps:$4 sm:$0xff]  }
  0x6e   :  { %1954 = vmatprep.subr.bf16.mxu0 %v5260_v31  ;;  %1997 = vmatprep.subr.bf16.mxu1 %v5263_v32  ;;  %v5348_v31 = vld [vmem:[#allocation2 + $0x700] ss:$144 sps:$4 sm:$0xff]   ;;  %v5351_v32 = vld [vmem:[#allocation2 + $0x708] ss:$144 sps:$4 sm:$0xff]  }
  0x71   :  { %1955 = vmatpush1.bf16.msra.mxu0 %v5258_v33  ;;  %1998 = vmatpush1.bf16.msra.mxu1 %v5261_v34  ;;  %v5356_v33 = vld [vmem:[#allocation2 + $0x824] ss:$144 sps:$4 sm:$0xff]   ;;  %v5359_v34 = vld [vmem:[#allocation2 + $0x82c] ss:$144 sps:$4 sm:$0xff]  }
  0x72   :  { %2026 = vmatprep.subr.bf16.mxu0 %v5266_v36  ;;  %2069 = vmatprep.subr.bf16.mxu1 %v5269_v37  ;;  %v5354_v36 = vld [vmem:[#allocation2 + $0x820] ss:$144 sps:$4 sm:$0xff]   ;;  %v5357_v37 = vld [vmem:[#allocation2 + $0x828] ss:$144 sps:$4 sm:$0xff]  }
  0x74   :  { %1973 = vmatmul.mubr.bf16.vlgmr.msra.gmra.mrb[8].mxu0 %v5911_v35  ;;  %2016 = vmatmul.mubr.bf16.vlgmr.msra.gmra.mrb[8].mxu1 %v5911_v35 }
  0x75   :  { %2027 = vmatpush1.bf16.msra.mxu0 %v5264_v38  ;;  %2070 = vmatpush1.bf16.msra.mxu1 %v5267_v39  ;;  %v5362_v38 = vld [vmem:[#allocation2 + $0x54] ss:$144 sps:$4 sm:$0xff]   ;;  %v5365_v39 = vld [vmem:[#allocation2 + $0x5c] ss:$144 sps:$4 sm:$0xff]  }
  0x76   :  { %2028 = vmatprep.subr.bf16.mxu0 %v5272_v40  ;;  %2071 = vmatprep.subr.bf16.mxu1 %v5275_v41  ;;  %v5360_v40 = vld [vmem:[#allocation2 + $0x50] ss:$144 sps:$4 sm:$0xff]   ;;  %v5363_v41 = vld [vmem:[#allocation2 + $0x58] ss:$144 sps:$4 sm:$0xff]  }
  0x77   :  { %2058 = vmatprep.mubr.bf16.mxu0 %v5868_v0  ;;  %2101 = vmatprep.mubr.bf16.mxu1 %v5868_v0 }
  0x79   :  { %2029 = vmatpush1.bf16.msra.mxu0 %v5270_v42  ;;  %2072 = vmatpush1.bf16.msra.mxu1 %v5273_v43  ;;  %v5368_v42 = vld [vmem:[#allocation2 + $0x174] ss:$144 sps:$4 sm:$0xff]   ;;  %v5371_v43 = vld [vmem:[#allocation2 + $0x17c] ss:$144 sps:$4 sm:$0xff]  }
  0x7a   :  { %2030 = vmatprep.subr.bf16.mxu0 %v5278_v44  ;;  %2073 = vmatprep.subr.bf16.mxu1 %v5281_v45  ;;  %v5366_v44 = vld [vmem:[#allocation2 + $0x170] ss:$144 sps:$4 sm:$0xff]   ;;  %v5369_v45 = vld [vmem:[#allocation2 + $0x178] ss:$144 sps:$4 sm:$0xff]  }
  0x7d   :  { %2031 = vmatpush1.bf16.msra.mxu0 %v5276_v46  ;;  %2074 = vmatpush1.bf16.msra.mxu1 %v5279_v47  ;;  %v5374_v46 = vld [vmem:[#allocation2 + $0x294] ss:$144 sps:$4 sm:$0xff]   ;;  %v5377_v47 = vld [vmem:[#allocation2 + $0x29c] ss:$144 sps:$4 sm:$0xff]  }
  0x7e   :  { %2032 = vmatprep.subr.bf16.mxu0 %v5284_v48  ;;  %2075 = vmatprep.subr.bf16.mxu1 %v5287_v49  ;;  %v5372_v48 = vld [vmem:[#allocation2 + $0x290] ss:$144 sps:$4 sm:$0xff]   ;;  %v5375_v49 = vld [vmem:[#allocation2 + $0x298] ss:$144 sps:$4 sm:$0xff]  }
  0x81   :  { %2033 = vmatpush1.bf16.msra.mxu0 %v5282_v50  ;;  %2076 = vmatpush1.bf16.msra.mxu1 %v5285_v51  ;;  %v5380_v50 = vld [vmem:[#allocation2 + $0x3b4] ss:$144 sps:$4 sm:$0xff]   ;;  %v5378_v51 = vld [vmem:[#allocation2 + $0x3b0] ss:$144 sps:$4 sm:$0xff]  }
  0x82   :  { %2034 = vmatprep.subr.bf16.mxu0 %v5290_v52  ;;  %2077 = vmatprep.subr.bf16.mxu1 %v5293_v53  ;;  %v5381_v52 = vld [vmem:[#allocation2 + $0x3b8] ss:$144 sps:$4 sm:$0xff]   ;;  %v5386_v53 = vld [vmem:[#allocation2 + $0x4d4] ss:$144 sps:$4 sm:$0xff]  }
  0x85   :  { %2035 = vmatpush1.bf16.msra.mxu0 %v5288_v54  ;;  %2078 = vmatpush1.bf16.msra.mxu1 %v5291_v55  ;;  %v5389_v54 = vld [vmem:[#allocation2 + $0x4dc] ss:$144 sps:$4 sm:$0xff]   ;;  %v5384_v55 = vld [vmem:[#allocation2 + $0x4d0] ss:$144 sps:$4 sm:$0xff]  }
  0x86   :  { %2036 = vmatprep.subr.bf16.mxu0 %v5296_v56  ;;  %2079 = vmatprep.subr.bf16.mxu1 %v5299_v57  ;;  %v5387_v56 = vld [vmem:[#allocation2 + $0x4d8] ss:$144 sps:$4 sm:$0xff]   ;;  %v5392_v57 = vld [vmem:[#allocation2 + $0x5f4] ss:$144 sps:$4 sm:$0xff]  }
  0x89   :  { %2037 = vmatpush1.bf16.msra.mxu0 %v5294_v58  ;;  %2080 = vmatpush1.bf16.msra.mxu1 %v5297_v59  ;;  %v5395_v58 = vld [vmem:[#allocation2 + $0x5fc] ss:$144 sps:$4 sm:$0xff]   ;;  %v5390_v59 = vld [vmem:[#allocation2 + $0x5f0] ss:$144 sps:$4 sm:$0xff]  }
  0x8a   :  { %2038 = vmatprep.subr.bf16.mxu0 %v5302_v60  ;;  %2081 = vmatprep.subr.bf16.mxu1 %v5305_v61  ;;  %v5393_v60 = vld [vmem:[#allocation2 + $0x5f8] ss:$144 sps:$4 sm:$0xff]   ;;  %v5398_v61 = vld [vmem:[#allocation2 + $0x714] ss:$144 sps:$4 sm:$0xff]  }
  0x8d   :  { %2039 = vmatpush1.bf16.msra.mxu0 %v5300_v62  ;;  %2082 = vmatpush1.bf16.msra.mxu1 %v5303_v63  ;;  %v5401_v62 = vld [vmem:[#allocation2 + $0x71c] ss:$144 sps:$4 sm:$0xff]   ;;  %v5396_v63 = vld [vmem:[#allocation2 + $0x710] ss:$144 sps:$4 sm:$0xff]  }
  0x8e   :  { %2040 = vmatprep.subr.bf16.mxu0 %v5308_v1  ;;  %2083 = vmatprep.subr.bf16.mxu1 %v5311_v2  ;;  %v5399_v1 = vld [vmem:[#allocation2 + $0x718] ss:$144 sps:$4 sm:$0xff]   ;;  %v5404_v2 = vld [vmem:[#allocation2 + $0x834] ss:$144 sps:$4 sm:$0xff]  }
  0x91   :  { %2041 = vmatpush1.bf16.msra.mxu0 %v5306_v3  ;;  %2084 = vmatpush1.bf16.msra.mxu1 %v5309_v4  ;;  %v5407_v3 = vld [vmem:[#allocation2 + $0x83c] ss:$144 sps:$4 sm:$0xff]   ;;  %v5402_v4 = vld [vmem:[#allocation2 + $0x830] ss:$144 sps:$4 sm:$0xff]  }
  0x92   :  { %2112 = vmatprep.subr.bf16.mxu0 %v5314_v5  ;;  %2155 = vmatprep.subr.bf16.mxu1 %v5317_v6  ;;  %v5405_v5 = vld [vmem:[#allocation2 + $0x838] ss:$144 sps:$4 sm:$0xff]   ;;  %v5410_v6 = vld [vmem:[#allocation2 + $0x64] ss:$144 sps:$4 sm:$0xff]  }
  0x94   :  { %2059 = vmatmul.mubr.bf16.vlgmr.msra.gmra.mrb[12].mxu0 %v5911_v35  ;;  %2102 = vmatmul.mubr.bf16.vlgmr.msra.gmra.mrb[12].mxu1 %v5911_v35 }
  0x95   :  { %2113 = vmatpush1.bf16.msra.mxu0 %v5312_v7  ;;  %2156 = vmatpush1.bf16.msra.mxu1 %v5315_v8  ;;  %v5413_v7 = vld [vmem:[#allocation2 + $0x6c] ss:$144 sps:$4 sm:$0xff]   ;;  %v5408_v8 = vld [vmem:[#allocation2 + $0x60] ss:$144 sps:$4 sm:$0xff]  }
  0x96   :  { %2114 = vmatprep.subr.bf16.mxu0 %v5320_v9  ;;  %2157 = vmatprep.subr.bf16.mxu1 %v5323_v10  ;;  %v5411_v9 = vld [vmem:[#allocation2 + $0x68] ss:$144 sps:$4 sm:$0xff]   ;;  %v5416_v10 = vld [vmem:[#allocation2 + $0x184] ss:$144 sps:$4 sm:$0xff]  }
  0x97   :  { %2144 = vmatprep.mubr.bf16.mxu0 %v5868_v0  ;;  %2187 = vmatprep.mubr.bf16.mxu1 %v5868_v0 }
  0x99   :  { %2115 = vmatpush1.bf16.msra.mxu0 %v5318_v11  ;;  %2158 = vmatpush1.bf16.msra.mxu1 %v5321_v12  ;;  %v5419_v11 = vld [vmem:[#allocation2 + $0x18c] ss:$144 sps:$4 sm:$0xff]   ;;  %v5414_v12 = vld [vmem:[#allocation2 + $0x180] ss:$144 sps:$4 sm:$0xff]  }
  0x9a   :  { %2116 = vmatprep.subr.bf16.mxu0 %v5326_v13  ;;  %2159 = vmatprep.subr.bf16.mxu1 %v5329_v14  ;;  %v5417_v13 = vld [vmem:[#allocation2 + $0x188] ss:$144 sps:$4 sm:$0xff]  }
  0x9b   :  { %v5936_v14 = vld [vmem:[%s6642_s0] sm:$0xff]  }
  0x9d   :  { %2117 = vmatpush1.bf16.msra.mxu0 %v5324_v15  ;;  %2160 = vmatpush1.bf16.msra.mxu1 %v5327_v16  ;;  %v5422_v15 = vld [vmem:[#allocation2 + $0x2a4] ss:$144 sps:$4 sm:$0xff]   ;;  %v5425_v16 = vld [vmem:[#allocation2 + $0x2ac] ss:$144 sps:$4 sm:$0xff]  }
  0x9e   :  { %2118 = vmatprep.subr.bf16.mxu0 %v5332_v17  ;;  %2161 = vmatprep.subr.bf16.mxu1 %v5335_v18  ;;  %v5420_v17 = vld [vmem:[#allocation2 + $0x2a0] ss:$144 sps:$4 sm:$0xff]   ;;  %v5423_v18 = vld [vmem:[#allocation2 + $0x2a8] ss:$144 sps:$4 sm:$0xff]  }
  0xa1   :  { %2119 = vmatpush1.bf16.msra.mxu0 %v5330_v19  ;;  %2162 = vmatpush1.bf16.msra.mxu1 %v5333_v20  ;;  %v5428_v19 = vld [vmem:[#allocation2 + $0x3c4] ss:$144 sps:$4 sm:$0xff]   ;;  %v5431_v20 = vld [vmem:[#allocation2 + $0x3cc] ss:$144 sps:$4 sm:$0xff]  }
  0xa2   :  { %2120 = vmatprep.subr.bf16.mxu0 %v5338_v21  ;;  %2163 = vmatprep.subr.bf16.mxu1 %v5341_v22  ;;  %v5426_v21 = vld [vmem:[#allocation2 + $0x3c0] ss:$144 sps:$4 sm:$0xff]   ;;  %v5429_v22 = vld [vmem:[#allocation2 + $0x3c8] ss:$144 sps:$4 sm:$0xff]  }
  0xa5   :  { %2121 = vmatpush1.bf16.msra.mxu0 %v5336_v23  ;;  %2164 = vmatpush1.bf16.msra.mxu1 %v5339_v24  ;;  %v5434_v23 = vld [vmem:[#allocation2 + $0x4e4] ss:$144 sps:$4 sm:$0xff]   ;;  %v5437_v24 = vld [vmem:[#allocation2 + $0x4ec] ss:$144 sps:$4 sm:$0xff]  }
  0xa6   :  { %2122 = vmatprep.subr.bf16.mxu0 %v5344_v25  ;;  %2165 = vmatprep.subr.bf16.mxu1 %v5347_v26  ;;  %v5432_v25 = vld [vmem:[#allocation2 + $0x4e0] ss:$144 sps:$4 sm:$0xff]   ;;  %v5435_v26 = vld [vmem:[#allocation2 + $0x4e8] ss:$144 sps:$4 sm:$0xff]  }
  0xa9   :  { %2123 = vmatpush1.bf16.msra.mxu0 %v5342_v27  ;;  %2166 = vmatpush1.bf16.msra.mxu1 %v5345_v28  ;;  %v5440_v27 = vld [vmem:[#allocation2 + $0x604] ss:$144 sps:$4 sm:$0xff]   ;;  %v5443_v28 = vld [vmem:[#allocation2 + $0x60c] ss:$144 sps:$4 sm:$0xff]  }
  0xaa   :  { %2124 = vmatprep.subr.bf16.mxu0 %v5350_v29  ;;  %2167 = vmatprep.subr.bf16.mxu1 %v5353_v30  ;;  %v5438_v29 = vld [vmem:[#allocation2 + $0x600] ss:$144 sps:$4 sm:$0xff]   ;;  %v5441_v30 = vld [vmem:[#allocation2 + $0x608] ss:$144 sps:$4 sm:$0xff]  }
  0xad   :  { %2125 = vmatpush1.bf16.msra.mxu0 %v5348_v31  ;;  %2168 = vmatpush1.bf16.msra.mxu1 %v5351_v32  ;;  %v5446_v31 = vld [vmem:[#allocation2 + $0x724] ss:$144 sps:$4 sm:$0xff]   ;;  %v5449_v32 = vld [vmem:[#allocation2 + $0x72c] ss:$144 sps:$4 sm:$0xff]  }
  0xae   :  { %2126 = vmatprep.subr.bf16.mxu0 %v5356_v33  ;;  %2169 = vmatprep.subr.bf16.mxu1 %v5359_v34  ;;  %v5444_v33 = vld [vmem:[#allocation2 + $0x720] ss:$144 sps:$4 sm:$0xff]   ;;  %v5447_v34 = vld [vmem:[#allocation2 + $0x728] ss:$144 sps:$4 sm:$0xff]  }
  0xb1   :  { %2127 = vmatpush1.bf16.msra.mxu0 %v5354_v36  ;;  %2170 = vmatpush1.bf16.msra.mxu1 %v5357_v37  ;;  %v5452_v36 = vld [vmem:[#allocation2 + $0x844] ss:$144 sps:$4 sm:$0xff]   ;;  %v5455_v37 = vld [vmem:[#allocation2 + $0x84c] ss:$144 sps:$4 sm:$0xff]  }
  0xb2   :  { %2198 = vmatprep.subr.bf16.mxu0 %v5362_v38  ;;  %2241 = vmatprep.subr.bf16.mxu1 %v5365_v39  ;;  %v5450_v38 = vld [vmem:[#allocation2 + $0x840] ss:$144 sps:$4 sm:$0xff]   ;;  %v5453_v39 = vld [vmem:[#allocation2 + $0x848] ss:$144 sps:$4 sm:$0xff]  }
  0xb4   :  { %2145 = vmatmul.mubr.bf16.vlgmr.msra.gmra.mrb[16].mxu0 %v5911_v35  ;;  %2188 = vmatmul.mubr.bf16.vlgmr.msra.gmra.mrb[16].mxu1 %v5911_v35  ;;  %v5383_v35 = vld [vmem:[#allocation2 + $0x3bc] ss:$144 sps:$4 sm:$0xff]  }
  0xb5   :  { %2199 = vmatpush1.bf16.msra.mxu0 %v5360_v40  ;;  %2242 = vmatpush1.bf16.msra.mxu1 %v5363_v41  ;;  %v5458_v40 = vld [vmem:[#allocation2 + $0x74] ss:$144 sps:$4 sm:$0xff]   ;;  %v5461_v41 = vld [vmem:[#allocation2 + $0x7c] ss:$144 sps:$4 sm:$0xff]  }
  0xb6   :  { %2200 = vmatprep.subr.bf16.mxu0 %v5368_v42  ;;  %2243 = vmatprep.subr.bf16.mxu1 %v5371_v43  ;;  %v5456_v42 = vld [vmem:[#allocation2 + $0x70] ss:$144 sps:$4 sm:$0xff]   ;;  %v5459_v43 = vld [vmem:[#allocation2 + $0x78] ss:$144 sps:$4 sm:$0xff]  }
  0xb7   :  { %2230 = vmatprep.mubr.bf16.mxu0 %v5868_v0  ;;  %2273 = vmatprep.mubr.bf16.mxu1 %v5868_v0 }
  0xb9   :  { %2201 = vmatpush1.bf16.msra.mxu0 %v5366_v44  ;;  %2244 = vmatpush1.bf16.msra.mxu1 %v5369_v45  ;;  %v5464_v44 = vld [vmem:[#allocation2 + $0x194] ss:$144 sps:$4 sm:$0xff]   ;;  %v5467_v45 = vld [vmem:[#allocation2 + $0x19c] ss:$144 sps:$4 sm:$0xff]  }
  0xba   :  { %2202 = vmatprep.subr.bf16.mxu0 %v5374_v46  ;;  %2245 = vmatprep.subr.bf16.mxu1 %v5377_v47  ;;  %v5462_v46 = vld [vmem:[#allocation2 + $0x190] ss:$144 sps:$4 sm:$0xff]   ;;  %v5465_v47 = vld [vmem:[#allocation2 + $0x198] ss:$144 sps:$4 sm:$0xff]  }
  0xbd   :  { %2203 = vmatpush1.bf16.msra.mxu0 %v5372_v48  ;;  %2246 = vmatpush1.bf16.msra.mxu1 %v5375_v49  ;;  %v5470_v48 = vld [vmem:[#allocation2 + $0x2b4] ss:$144 sps:$4 sm:$0xff]   ;;  %v5473_v49 = vld [vmem:[#allocation2 + $0x2bc] ss:$144 sps:$4 sm:$0xff]  }
  0xbe   :  { %2204 = vmatprep.subr.bf16.mxu0 %v5380_v50  ;;  %2247 = vmatprep.subr.bf16.mxu1 %v5383_v35  ;;  %v5468_v50 = vld [vmem:[#allocation2 + $0x2b0] ss:$144 sps:$4 sm:$0xff]   ;;  %v5471_v35 = vld [vmem:[#allocation2 + $0x2b8] ss:$144 sps:$4 sm:$0xff]  }
  0xc1   :  { %2205 = vmatpush1.bf16.msra.mxu0 %v5378_v51  ;;  %2248 = vmatpush1.bf16.msra.mxu1 %v5381_v52  ;;  %v5476_v51 = vld [vmem:[#allocation2 + $0x3d4] ss:$144 sps:$4 sm:$0xff]   ;;  %v5479_v52 = vld [vmem:[#allocation2 + $0x3dc] ss:$144 sps:$4 sm:$0xff]  }
  0xc2   :  { %2206 = vmatprep.subr.bf16.mxu0 %v5386_v53  ;;  %2249 = vmatprep.subr.bf16.mxu1 %v5389_v54  ;;  %v5474_v53 = vld [vmem:[#allocation2 + $0x3d0] ss:$144 sps:$4 sm:$0xff]   ;;  %v5477_v54 = vld [vmem:[#allocation2 + $0x3d8] ss:$144 sps:$4 sm:$0xff]  }
  0xc5   :  { %2207 = vmatpush1.bf16.msra.mxu0 %v5384_v55  ;;  %2250 = vmatpush1.bf16.msra.mxu1 %v5387_v56  ;;  %v5482_v55 = vld [vmem:[#allocation2 + $0x4f4] ss:$144 sps:$4 sm:$0xff]   ;;  %v5485_v56 = vld [vmem:[#allocation2 + $0x4fc] ss:$144 sps:$4 sm:$0xff]  }
  0xc6   :  { %2208 = vmatprep.subr.bf16.mxu0 %v5392_v57  ;;  %2251 = vmatprep.subr.bf16.mxu1 %v5395_v58  ;;  %v5480_v57 = vld [vmem:[#allocation2 + $0x4f0] ss:$144 sps:$4 sm:$0xff]   ;;  %v5483_v58 = vld [vmem:[#allocation2 + $0x4f8] ss:$144 sps:$4 sm:$0xff]  }
  0xc9   :  { %2209 = vmatpush1.bf16.msra.mxu0 %v5390_v59  ;;  %2252 = vmatpush1.bf16.msra.mxu1 %v5393_v60  ;;  %v5488_v59 = vld [vmem:[#allocation2 + $0x614] ss:$144 sps:$4 sm:$0xff]   ;;  %v5491_v60 = vld [vmem:[#allocation2 + $0x61c] ss:$144 sps:$4 sm:$0xff]  }
  0xca   :  { %2210 = vmatprep.subr.bf16.mxu0 %v5398_v61  ;;  %2253 = vmatprep.subr.bf16.mxu1 %v5401_v62  ;;  %v5486_v61 = vld [vmem:[#allocation2 + $0x610] ss:$144 sps:$4 sm:$0xff]   ;;  %v5489_v62 = vld [vmem:[#allocation2 + $0x618] ss:$144 sps:$4 sm:$0xff]  }
  0xcd   :  { %2211 = vmatpush1.bf16.msra.mxu0 %v5396_v63  ;;  %2254 = vmatpush1.bf16.msra.mxu1 %v5399_v1  ;;  %v5494_v63 = vld [vmem:[#allocation2 + $0x734] ss:$144 sps:$4 sm:$0xff]   ;;  %v5497_v1 = vld [vmem:[#allocation2 + $0x73c] ss:$144 sps:$4 sm:$0xff]  }
  0xce   :  { %2212 = vmatprep.subr.bf16.mxu0 %v5404_v2  ;;  %2255 = vmatprep.subr.bf16.mxu1 %v5407_v3 }
  0xd1   :  { %2213 = vmatpush1.bf16.msra.mxu0 %v5402_v4  ;;  %2256 = vmatpush1.bf16.msra.mxu1 %v5405_v5 }
  0xd2   :  { %2284 = vmatprep.subr.bf16.mxu0 %v5410_v6  ;;  %2327 = vmatprep.subr.bf16.mxu1 %v5413_v7 }
  0xd4   :  { %2231 = vmatmul.mubr.bf16.vlgmr.msra.gmra.mrb[20].mxu0 %v5936_v14  ;;  %2274 = vmatmul.mubr.bf16.vlgmr.msra.gmra.mrb[20].mxu1 %v5936_v14 }
  0xd5   :  { %2285 = vmatpush1.bf16.msra.mxu0 %v5408_v8  ;;  %2328 = vmatpush1.bf16.msra.mxu1 %v5411_v9  ;;  %v5492_v8 = vld [vmem:[#allocation2 + $0x730] ss:$144 sps:$4 sm:$0xff]   ;;  %v5495_v9 = vld [vmem:[#allocation2 + $0x738] ss:$144 sps:$4 sm:$0xff]  }
  0xd6   :  { %2286 = vmatprep.subr.bf16.mxu0 %v5416_v10  ;;  %2329 = vmatprep.subr.bf16.mxu1 %v5419_v11 }
  0xd7   :  { %2316 = vmatprep.mubr.bf16.mxu0 %v5868_v0  ;;  %2359 = vmatprep.mubr.bf16.mxu1 %v5868_v0 }
  0xd9   :  { %2287 = vmatpush1.bf16.msra.mxu0 %v5414_v12  ;;  %2330 = vmatpush1.bf16.msra.mxu1 %v5417_v13  ;;  %v5500_v12 = vld [vmem:[#allocation2 + $0x854] ss:$144 sps:$4 sm:$0xff]   ;;  %v5503_v13 = vld [vmem:[#allocation2 + $0x85c] ss:$144 sps:$4 sm:$0xff]  }
  0xda   :  { %2288 = vmatprep.subr.bf16.mxu0 %v5422_v15  ;;  %2331 = vmatprep.subr.bf16.mxu1 %v5425_v16  ;;  %v5498_v15 = vld [vmem:[#allocation2 + $0x850] ss:$144 sps:$4 sm:$0xff]   ;;  %v5501_v16 = vld [vmem:[#allocation2 + $0x858] ss:$144 sps:$4 sm:$0xff]  }
  0xdd   :  { %2289 = vmatpush1.bf16.msra.mxu0 %v5420_v17  ;;  %2332 = vmatpush1.bf16.msra.mxu1 %v5423_v18  ;;  %v5506_v17 = vld [vmem:[#allocation2 + $0x84] ss:$144 sps:$4 sm:$0xff]   ;;  %v5509_v18 = vld [vmem:[#allocation2 + $0x8c] ss:$144 sps:$4 sm:$0xff]  }
  0xde   :  { %2290 = vmatprep.subr.bf16.mxu0 %v5428_v19  ;;  %2333 = vmatprep.subr.bf16.mxu1 %v5431_v20  ;;  %v5504_v19 = vld [vmem:[#allocation2 + $0x80] ss:$144 sps:$4 sm:$0xff]   ;;  %v5507_v20 = vld [vmem:[#allocation2 + $0x88] ss:$144 sps:$4 sm:$0xff]  }
  0xe1   :  { %2291 = vmatpush1.bf16.msra.mxu0 %v5426_v21  ;;  %2334 = vmatpush1.bf16.msra.mxu1 %v5429_v22  ;;  %v5512_v21 = vld [vmem:[#allocation2 + $0x1a4] ss:$144 sps:$4 sm:$0xff]   ;;  %v5515_v22 = vld [vmem:[#allocation2 + $0x1ac] ss:$144 sps:$4 sm:$0xff]  }
  0xe2   :  { %2292 = vmatprep.subr.bf16.mxu0 %v5434_v23  ;;  %2335 = vmatprep.subr.bf16.mxu1 %v5437_v24  ;;  %v5510_v23 = vld [vmem:[#allocation2 + $0x1a0] ss:$144 sps:$4 sm:$0xff]   ;;  %v5513_v24 = vld [vmem:[#allocation2 + $0x1a8] ss:$144 sps:$4 sm:$0xff]  }
  0xe5   :  { %2293 = vmatpush1.bf16.msra.mxu0 %v5432_v25  ;;  %2336 = vmatpush1.bf16.msra.mxu1 %v5435_v26  ;;  %v5518_v25 = vld [vmem:[#allocation2 + $0x2c4] ss:$144 sps:$4 sm:$0xff]   ;;  %v5521_v26 = vld [vmem:[#allocation2 + $0x2cc] ss:$144 sps:$4 sm:$0xff]  }
  0xe6   :  { %2294 = vmatprep.subr.bf16.mxu0 %v5440_v27  ;;  %2337 = vmatprep.subr.bf16.mxu1 %v5443_v28  ;;  %v5516_v27 = vld [vmem:[#allocation2 + $0x2c0] ss:$144 sps:$4 sm:$0xff]   ;;  %v5519_v28 = vld [vmem:[#allocation2 + $0x2c8] ss:$144 sps:$4 sm:$0xff]  }
  0xe9   :  { %2295 = vmatpush1.bf16.msra.mxu0 %v5438_v29  ;;  %2338 = vmatpush1.bf16.msra.mxu1 %v5441_v30  ;;  %v5524_v29 = vld [vmem:[#allocation2 + $0x3e4] ss:$144 sps:$4 sm:$0xff]   ;;  %v5527_v30 = vld [vmem:[#allocation2 + $0x3ec] ss:$144 sps:$4 sm:$0xff]  }
  0xea   :  { %2296 = vmatprep.subr.bf16.mxu0 %v5446_v31  ;;  %2339 = vmatprep.subr.bf16.mxu1 %v5449_v32  ;;  %v5522_v31 = vld [vmem:[#allocation2 + $0x3e0] ss:$144 sps:$4 sm:$0xff]   ;;  %v5525_v32 = vld [vmem:[#allocation2 + $0x3e8] ss:$144 sps:$4 sm:$0xff]  }
  0xed   :  { %2297 = vmatpush1.bf16.msra.mxu0 %v5444_v33  ;;  %2340 = vmatpush1.bf16.msra.mxu1 %v5447_v34  ;;  %v5530_v33 = vld [vmem:[#allocation2 + $0x504] ss:$144 sps:$4 sm:$0xff]   ;;  %v5533_v34 = vld [vmem:[#allocation2 + $0x50c] ss:$144 sps:$4 sm:$0xff]  }
  0xee   :  { %2298 = vmatprep.subr.bf16.mxu0 %v5452_v36  ;;  %2341 = vmatprep.subr.bf16.mxu1 %v5455_v37  ;;  %v5528_v36 = vld [vmem:[#allocation2 + $0x500] ss:$144 sps:$4 sm:$0xff]   ;;  %v5531_v37 = vld [vmem:[#allocation2 + $0x508] ss:$144 sps:$4 sm:$0xff]  }
  0xf1   :  { %2299 = vmatpush1.bf16.msra.mxu0 %v5450_v38  ;;  %2342 = vmatpush1.bf16.msra.mxu1 %v5453_v39  ;;  %v5539_v38 = vld [vmem:[#allocation2 + $0x62c] ss:$144 sps:$4 sm:$0xff]   ;;  %v5534_v39 = vld [vmem:[#allocation2 + $0x620] ss:$144 sps:$4 sm:$0xff]  }
  0xf2   :  { %2370 = vmatprep.subr.bf16.mxu0 %v5458_v40  ;;  %2413 = vmatprep.subr.bf16.mxu1 %v5461_v41  ;;  %v5537_v40 = vld [vmem:[#allocation2 + $0x628] ss:$144 sps:$4 sm:$0xff]   ;;  %v5542_v41 = vld [vmem:[#allocation2 + $0x744] ss:$144 sps:$4 sm:$0xff]  }
  0xf4   :  { %2317 = vmatmul.mubr.bf16.vlgmr.msra.gmra.mrb[24].mxu0 %v5936_v14  ;;  %2360 = vmatmul.mubr.bf16.vlgmr.msra.gmra.mrb[24].mxu1 %v5936_v14 }
  0xf5   :  { %2371 = vmatpush1.bf16.msra.mxu0 %v5456_v42  ;;  %2414 = vmatpush1.bf16.msra.mxu1 %v5459_v43  ;;  %v5545_v42 = vld [vmem:[#allocation2 + $0x74c] ss:$144 sps:$4 sm:$0xff]  }
  0xf6   :  { %2372 = vmatprep.subr.bf16.mxu0 %v5464_v44  ;;  %2415 = vmatprep.subr.bf16.mxu1 %v5467_v45 }
  0xf7   :  { %2402 = vmatprep.mubr.bf16.mxu0 %v5868_v0  ;;  %2445 = vmatprep.mubr.bf16.mxu1 %v5868_v0 }
  0xf9   :  { %2373 = vmatpush1.bf16.msra.mxu0 %v5462_v46  ;;  %2416 = vmatpush1.bf16.msra.mxu1 %v5465_v47 }
  0xfa   :  { %2374 = vmatprep.subr.bf16.mxu0 %v5470_v48  ;;  %2417 = vmatprep.subr.bf16.mxu1 %v5473_v49  ;;  %v5540_v49 = vld [vmem:[#allocation2 + $0x740] ss:$144 sps:$4 sm:$0xff]  }
  0xfd   :  { %2375 = vmatpush1.bf16.msra.mxu0 %v5468_v50  ;;  %2418 = vmatpush1.bf16.msra.mxu1 %v5471_v35  ;;  %v5543_v50 = vld [vmem:[#allocation2 + $0x748] ss:$144 sps:$4 sm:$0xff]  }
  0xfe   :  { %2376 = vmatprep.subr.bf16.mxu0 %v5476_v51  ;;  %2419 = vmatprep.subr.bf16.mxu1 %v5479_v52  ;;  %v5548_v52 = vld [vmem:[#allocation2 + $0x864] ss:$144 sps:$4 sm:$0xff]  }
 0x101   :  { %2377 = vmatpush1.bf16.msra.mxu0 %v5474_v53  ;;  %2420 = vmatpush1.bf16.msra.mxu1 %v5477_v54  ;;  %v5551_v53 = vld [vmem:[#allocation2 + $0x86c] ss:$144 sps:$4 sm:$0xff]   ;;  %v5546_v54 = vld [vmem:[#allocation2 + $0x860] ss:$144 sps:$4 sm:$0xff]  }
 0x102   :  { %2378 = vmatprep.subr.bf16.mxu0 %v5482_v55  ;;  %2421 = vmatprep.subr.bf16.mxu1 %v5485_v56  ;;  %v5549_v55 = vld [vmem:[#allocation2 + $0x868] ss:$144 sps:$4 sm:$0xff]  }
 0x103   :  { %v5552_v56 = vld [vmem:[%s6645_s3 + $0x40] sm:$0xff]  }
 0x105   :  { %2379 = vmatpush1.bf16.msra.mxu0 %v5480_v57  ;;  %2422 = vmatpush1.bf16.msra.mxu1 %v5483_v58  ;;  %v5568_v57 = vld [vmem:[%s6645_s3 + $0xc0] sm:$0xff]  }
 0x106   :  { %2380 = vmatprep.subr.bf16.mxu0 %v5488_v59  ;;  %2423 = vmatprep.subr.bf16.mxu1 %v5491_v60  ;;  %v5553_v58 = vld [vmem:[%s6645_s3] sm:$0xff]   ;;  %v5554_v60 = vld [vmem:[%s6645_s3 + $0x48] sm:$0xff]  }
 0x107   :  { %v5946_v2 = vpop.f32.mrb[0].mxu0  ;;  %v5948_v3 = vpop.f32.mrb[0].mxu1  ;;  %v5570_v59 = vld [vmem:[%s6645_s3 + $0x80] sm:$0xff]  }
 0x108   :  { %v5950_v4 = vpop.f32.mrb[1].mxu0  ;;  %v5952_v5 = vpop.f32.mrb[1].mxu1 }
 0x109   :  { %v5954_v6 = vpop.f32.mrb[2].mxu0  ;;  %v5956_v7 = vpop.f32.mrb[2].mxu1  ;;  %2381 = vmatpush1.bf16.msra.mxu0 %v5486_v61  ;;  %2424 = vmatpush1.bf16.msra.mxu1 %v5489_v62  ;;  %v5572_v61 = vld [vmem:[%s6645_s3 + $0xc8] sm:$0xff]  }
 0x10a   :  { %v5958_v10 = vpop.f32.mrb[3].mxu0  ;;  %v5960_v11 = vpop.f32.mrb[3].mxu1  ;;  %2382 = vmatprep.subr.bf16.mxu0 %v5494_v63  ;;  %2425 = vmatprep.subr.bf16.mxu1 %v5497_v1  ;;  %v5555_v62 = vld [vmem:[%s6645_s3 + $0x8] sm:$0xff]   ;;  %v5556_v63 = vld [vmem:[%s6645_s3 + $0x50] sm:$0xff]  }
 0x10b   :  { %v5574_v1 = vld [vmem:[%s6645_s3 + $0x88] sm:$0xff]  }
 0x10d   :  { %2383 = vmatpush1.bf16.msra.mxu0 %v5492_v8  ;;  %2426 = vmatpush1.bf16.msra.mxu1 %v5495_v9  ;;  %v5557_v8 = vld [vmem:[%s6645_s3 + $0x10] sm:$0xff]   ;;  %v5558_v9 = vld [vmem:[%s6645_s3 + $0x58] sm:$0xff]  }
 0x10e   :  { %2384 = vmatprep.subr.bf16.mxu0 %v5500_v12  ;;  %2427 = vmatprep.subr.bf16.mxu1 %v5503_v13  ;;  %v5578_v12 = vld [vmem:[%s6645_s3 + $0x90] sm:$0xff]   ;;  %v5580_v13 = vld [vmem:[%s6645_s3 + $0xd8] sm:$0xff]  }
 0x111   :  { %2385 = vmatpush1.bf16.msra.mxu0 %v5498_v15  ;;  %2428 = vmatpush1.bf16.msra.mxu1 %v5501_v16  ;;  %v5559_v15 = vld [vmem:[%s6645_s3 + $0x18] sm:$0xff]   ;;  %v5560_v16 = vld [vmem:[%s6645_s3 + $0x60] sm:$0xff]  }
 0x112   :  { %2456 = vmatprep.subr.bf16.mxu0 %v5506_v17  ;;  %2499 = vmatprep.subr.bf16.mxu1 %v5509_v18  ;;  %v5582_v17 = vld [vmem:[%s6645_s3 + $0x98] sm:$0xff]   ;;  %v5584_v18 = vld [vmem:[%s6645_s3 + $0xe0] sm:$0xff]  }
 0x114   :  { %2403 = vmatmul.mubr.bf16.vlgmr.msra.gmra.mrb[28].mxu0 %v5936_v14  ;;  %2446 = vmatmul.mubr.bf16.vlgmr.msra.gmra.mrb[28].mxu1 %v5936_v14 }
 0x115   :  { %2457 = vmatpush1.bf16.msra.mxu0 %v5504_v19  ;;  %2500 = vmatpush1.bf16.msra.mxu1 %v5507_v20  ;;  %v5561_v19 = vld [vmem:[%s6645_s3 + $0x20] sm:$0xff]   ;;  %v5562_v20 = vld [vmem:[%s6645_s3 + $0x68] sm:$0xff]  }
 0x116   :  { %2458 = vmatprep.subr.bf16.mxu0 %v5512_v21  ;;  %2501 = vmatprep.subr.bf16.mxu1 %v5515_v22  ;;  %v5586_v21 = vld [vmem:[%s6645_s3 + $0xa0] sm:$0xff]   ;;  %v5588_v22 = vld [vmem:[%s6645_s3 + $0xe8] sm:$0xff]  }
 0x117   :  { %2488 = vmatprep.mubr.bf16.mxu0 %v5868_v0  ;;  %2531 = vmatprep.mubr.bf16.mxu1 %v5868_v0  ;;  %v5536_v0 = vld [vmem:[#allocation2 + $0x624] ss:$144 sps:$4 sm:$0xff]  }
 0x119   :  { %2459 = vmatpush1.bf16.msra.mxu0 %v5510_v23  ;;  %2502 = vmatpush1.bf16.msra.mxu1 %v5513_v24  ;;  %v5563_v23 = vld [vmem:[%s6645_s3 + $0x28] sm:$0xff]  }
 0x11a   :  { %2460 = vmatprep.subr.bf16.mxu0 %v5518_v25  ;;  %2503 = vmatprep.subr.bf16.mxu1 %v5521_v26  ;;  %v5590_v24 = vld [vmem:[%s6645_s3 + $0xa8] sm:$0xff]   ;;  %v5564_v25 = vld [vmem:[%s6645_s3 + $0x70] sm:$0xff]  }
 0x11b   :  { %v5592_v26 = vld [vmem:[%s6645_s3 + $0xf0] sm:$0xff]  }
 0x11d   :  { %2461 = vmatpush1.bf16.msra.mxu0 %v5516_v27  ;;  %2504 = vmatpush1.bf16.msra.mxu1 %v5519_v28 }
 0x11e   :  { %2462 = vmatprep.subr.bf16.mxu0 %v5524_v29  ;;  %2505 = vmatprep.subr.bf16.mxu1 %v5527_v30 }
 0x121   :  { %2463 = vmatpush1.bf16.msra.mxu0 %v5522_v31  ;;  %2506 = vmatpush1.bf16.msra.mxu1 %v5525_v32 }
 0x122   :  { %2464 = vmatprep.subr.bf16.mxu0 %v5530_v33  ;;  %2507 = vmatprep.subr.bf16.mxu1 %v5533_v34  ;;  %v5565_v33 = vld [vmem:[%s6645_s3 + $0x30] sm:$0xff]  }
 0x123   :  { %v5594_v34 = vld [vmem:[%s6645_s3 + $0xb0] sm:$0xff]  }
 0x125   :  { %2465 = vmatpush1.bf16.msra.mxu0 %v5528_v36  ;;  %2508 = vmatpush1.bf16.msra.mxu1 %v5531_v37 }
 0x126   :  { %2466 = vmatprep.subr.bf16.mxu0 %v5536_v0  ;;  %2509 = vmatprep.subr.bf16.mxu1 %v5539_v38  ;;  %v5566_v0 = vld [vmem:[%s6645_s3 + $0x78] sm:$0xff]  }
 0x127   :  { %v5966_v43 = vpop.f32.mrb[4].mxu0  ;;  %v5968_v44 = vpop.f32.mrb[4].mxu1  ;;  %v5596_v38 = vld [vmem:[%s6645_s3 + $0xf8] sm:$0xff]  }
 0x128   :  { %v5970_v45 = vpop.f32.mrb[5].mxu0  ;;  %v5972_v46 = vpop.f32.mrb[5].mxu1 }
 0x129   :  { %v5974_v47 = vpop.f32.mrb[6].mxu0  ;;  %v5976_v48 = vpop.f32.mrb[6].mxu1  ;;  %2467 = vmatpush1.bf16.msra.mxu0 %v5534_v39  ;;  %2510 = vmatpush1.bf16.msra.mxu1 %v5537_v40  ;;  %v5567_v39 = vld [vmem:[%s6645_s3 + $0x38] sm:$0xff]  }
 0x12a   :  { %v5978_v35 = vpop.f32.mrb[7].mxu0  ;;  %v5980_v51 = vpop.f32.mrb[7].mxu1  ;;  %2468 = vmatprep.subr.bf16.mxu0 %v5542_v41  ;;  %2511 = vmatprep.subr.bf16.mxu1 %v5545_v42  ;;  %v5598_v40 = vld [vmem:[%s6645_s3 + $0xb8] sm:$0xff]   ;;  %v5569_v41 = vld [vmem:[%s6645_s3 + $0x140] sm:$0xff]  }
 0x12b   :  { %v5600_v42 = vld [vmem:[%s6645_s3 + $0x1c0] sm:$0xff]  }
 0x12d   :  { %2469 = vmatpush1.bf16.msra.mxu0 %v5540_v49  ;;  %2512 = vmatpush1.bf16.msra.mxu1 %v5543_v50  ;;  %v4737_v49 = vmul.f32 -1.442695, %v5946_v2  ;;  %v4738_v50 = vmul.f32 -1.442695, %v5950_v4 }
 0x12e   :  { %2470 = vmatprep.subr.bf16.mxu0 %v5548_v52  ;;  %2513 = vmatprep.subr.bf16.mxu1 %v5551_v53  ;;  %v4755_v52 = vmul.f32 -1.442695, %v5954_v6  ;;  %v4756_v53 = vmul.f32 -1.442695, %v5958_v10 }
 0x12f   :  { %5696 = vpow2.f32 %v4737_v49 }
 0x130   :  { %5698 = vpow2.f32 %v4738_v50 }
 0x131   :  { %2471 = vmatpush1.bf16.msra.mxu0 %v5546_v54  ;;  %2514 = vmatpush1.bf16.msra.mxu1 %v5549_v55  ;;  %5700 = vpow2.f32 %v4755_v52 }
 0x132   :  { %4917 = vmatprep.subr.bf16.mxu0 %v5552_v56  ;;  %4939 = vmatprep.subr.bf16.mxu1 %v5568_v57  ;;  %5702 = vpow2.f32 %v4756_v53  ;;  %v2831_v53 = vld [vmem:[%s6643_s1 + $0x8] sm:$0xff] }
 0x134   :  { %2489 = vmatmul.mubr.bf16.vlgmr.msra.gmra.mrb[32].mxu0 %v5936_v14  ;;  %2532 = vmatmul.mubr.bf16.vlgmr.msra.gmra.mrb[32].mxu1 %v5936_v14  ;;  %v5576_v14 = vld [vmem:[%s6645_s3 + $0xd0] sm:$0xff]  }
 0x135   :  { %4918 = vmatpush3.bf16.msra.mxu0 %v5553_v58  ;;  %4940 = vmatpush3.bf16.msra.mxu1 %v5570_v59 }
 0x136   :  { %4919 = vmatprep.subr.bf16.mxu0 %v5554_v60  ;;  %4941 = vmatprep.subr.bf16.mxu1 %v5572_v61 }
 0x139   :  { %4920 = vmatpush3.bf16.msra.mxu0 %v5555_v62  ;;  %4942 = vmatpush3.bf16.msra.mxu1 %v5574_v1  ;;  %v5697_v62 = vpop.eup %5696 }
 0x13a   :  { %4921 = vmatprep.subr.bf16.mxu0 %v5556_v63  ;;  %4943 = vmatprep.subr.bf16.mxu1 %v5576_v14  ;;  %v5699_v63 = vpop.eup %5698 }
 0x13b   :  { %v5701_v1 = vpop.eup %5700 }
 0x13c   :  { %v5703_v14 = vpop.eup %5702 }
 0x13d   :  { %4922 = vmatpush3.bf16.msra.mxu0 %v5557_v8  ;;  %4944 = vmatpush3.bf16.msra.mxu1 %v5578_v12  ;;  %v2650_v8 = vadd.f32 1.0, %v5697_v62  ;;  %v2668_v12 = vadd.f32 1.0, %v5701_v1  ;;  %v2849_v1 = vld [vmem:[%s6643_s1 + $0x98] sm:$0xff] }
 0x13e   :  { %4923 = vmatprep.subr.bf16.mxu0 %v5558_v9  ;;  %4945 = vmatprep.subr.bf16.mxu1 %v5580_v13  ;;  %v2651_v9 = vadd.f32 1.0, %v5699_v63  ;;  %v2669_v13 = vadd.f32 1.0, %v5703_v14 }
 0x13f   :  { %5704 = vrcp.f32 %v2650_v8 }
 0x140   :  { %5706 = vrcp.f32 %v2651_v9 }
 0x141   :  { %4924 = vmatpush3.bf16.msra.mxu0 %v5559_v15  ;;  %4946 = vmatpush3.bf16.msra.mxu1 %v5582_v17  ;;  %5708 = vrcp.f32 %v2668_v12  ;;  %v4739_v15 = vmul.f32 -1.442695, %v5948_v3  ;;  %v4757_v17 = vmul.f32 -1.442695, %v5956_v7 }
 0x142   :  { %4925 = vmatprep.subr.bf16.mxu0 %v5560_v16  ;;  %4947 = vmatprep.subr.bf16.mxu1 %v5584_v18  ;;  %5710 = vrcp.f32 %v2669_v13  ;;  %v4740_v16 = vmul.f32 -1.442695, %v5952_v5 }
 0x143   :  { %5712 = vpow2.f32 %v4739_v15 }
 0x144   :  { %5714 = vpow2.f32 %v4740_v16 }
 0x145   :  { %4926 = vmatpush3.bf16.msra.mxu0 %v5561_v19  ;;  %4948 = vmatpush3.bf16.msra.mxu1 %v5586_v21  ;;  %v4758_v19 = vmul.f32 -1.442695, %v5960_v11  ;;  %v4741_v21 = vmul.f32 -1.442695, %v5966_v43  ;;  %5716 = vpow2.f32 %v4757_v17 }
 0x146   :  { %4927 = vmatprep.subr.bf16.mxu0 %v5562_v20  ;;  %4949 = vmatprep.subr.bf16.mxu1 %v5588_v22 }
 0x147   :  { %v6062_v27 = vpop.f32.mrb[8].mxu0  ;;  %v6064_v28 = vpop.f32.mrb[8].mxu1  ;;  %5718 = vpow2.f32 %v4758_v19  ;;  %v5571_v19 = vld [vmem:[%s6645_s3 + $0x100] sm:$0xff]  }
 0x148   :  { %v6066_v29 = vpop.f32.mrb[9].mxu0  ;;  %v6068_v30 = vpop.f32.mrb[9].mxu1  ;;  %5720 = vpow2.f32 %v4741_v21  ;;  %v5573_v21 = vld [vmem:[%s6645_s3 + $0x148] sm:$0xff]  }
 0x149   :  { %v6070_v31 = vpop.f32.mrb[10].mxu0  ;;  %v6072_v32 = vpop.f32.mrb[10].mxu1  ;;  %4928 = vmatpush3.bf16.msra.mxu0 %v5563_v23  ;;  %4950 = vmatpush3.bf16.msra.mxu1 %v5590_v24  ;;  %v4742_v23 = vmul.f32 -1.442695, %v5970_v45 }
 0x14a   :  { %v6080_v36 = vpop.f32.mrb[11].mxu0  ;;  %v6082_v37 = vpop.f32.mrb[11].mxu1  ;;  %4929 = vmatprep.subr.bf16.mxu0 %v5564_v25  ;;  %4951 = vmatprep.subr.bf16.mxu1 %v5592_v26  ;;  %v4759_v26 = vmul.f32 -1.442695, %v5974_v47 }
 0x14b   :  { %v5705_v18 = vpop.eup %5704  ;;  %5722 = vpow2.f32 %v4742_v23 }
 0x14c   :  { %v5707_v20 = vpop.eup %5706  ;;  %v2758_v25 = vmul.f32 %v5705_v18, %v5946_v2  ;;  %5724 = vpow2.f32 %v4759_v26 }
 0x14d   :  { %4930 = vmatpush3.bf16.msra.mxu0 %v5565_v33  ;;  %4952 = vmatpush3.bf16.msra.mxu1 %v5594_v34  ;;  %v5709_v22 = vpop.eup %5708  ;;  %v2759_v33 = vmul.f32 %v5707_v20, %v5950_v4  ;;  %v4760_v34 = vmul.f32 -1.442695, %v5978_v35  ;;  %v2830_v4 = vld [vmem:[%s6643_s1] sm:$0xff] }
 0x14e   :  { %4931 = vmatprep.subr.bf16.mxu0 %v5566_v0  ;;  %4953 = vmatprep.subr.bf16.mxu1 %v5596_v38  ;;  %v5711_v24 = vpop.eup %5710 }
 0x14f   :  { %v2777_v2 = vmul.f32 %v5711_v24, %v5958_v10  ;;  %5726 = vpow2.f32 %v4760_v34  ;;  %v5713_v15 = vpop.eup %5712  ;;  %v5575_v34 = vld [vmem:[%s6645_s3 + $0x108] sm:$0xff]  }
 0x150   :  { %v5715_v17 = vpop.eup %5714  ;;  %v2652_v23 = vadd.f32 1.0, %v5713_v15  ;;  %v4744_v15 = vmul.f32 -1.442695, %v5972_v46 }
 0x151   :  { %4932 = vmatpush3.bf16.msra.mxu0 %v5567_v39  ;;  %4954 = vmatpush3.bf16.msra.mxu1 %v5598_v40  ;;  %v2776_v39 = vmul.f32 %v5709_v22, %v5954_v6  ;;  %v2848_v6 = vld [vmem:[%s6643_s1 + $0x90] sm:$0xff]  ;;  %v5717_v20 = vpop.eup %5716 }
 0x152   :  { %4961 = vmatprep.subr.bf16.mxu0 %v5569_v41  ;;  %4983 = vmatprep.subr.bf16.mxu1 %v5600_v42  ;;  %v5719_v22 = vpop.eup %5718  ;;  %5728 = vrcp.f32 %v2652_v23  ;;  %v5593_v23 = vld [vmem:[%s6645_s3 + $0x170] sm:$0xff]  }
 0x153   :  { %v5721_v24 = vpop.eup %5720 }
 0x155   :  { %v5723_v26 = vpop.eup %5722 }
 0x167   :  { %v6106_v54 = vpop.f32.mrb[12].mxu0  ;;  %v6108_v55 = vpop.f32.mrb[12].mxu1 }
 0x168   :  { %v6110_v56 = vpop.f32.mrb[13].mxu0  ;;  %v6112_v57 = vpop.f32.mrb[13].mxu1 }
 0x169   :  { %v6114_v58 = vpop.f32.mrb[14].mxu0  ;;  %v6116_v59 = vpop.f32.mrb[14].mxu1 }
 0x16a   :  { %v6118_v60 = vpop.f32.mrb[15].mxu0  ;;  %v6120_v61 = vpop.f32.mrb[15].mxu1 }
 0x187   :  { %v6132_v0 = vpop.f32.mrb[16].mxu0  ;;  %v2189_v38 = vpop.f32.mrb[16].mxu1 }
 0x188   :  { %v2794_v40 = vmul.f32 %v2758_v25, %v2189_v38  ;;  %v6135_v41 = vpop.f32.mrb[17].mxu0  ;;  %v2191_v42 = vpop.f32.mrb[17].mxu1  ;;  %v2653_v25 = vadd.f32 1.0, %v5715_v17  ;;  %v4761_v17 = vmul.f32 -1.442695, %v5976_v48 }
 0x189   :  { %v2795_v49 = vmul.f32 %v2759_v33, %v2191_v42  ;;  %v6141_v50 = vpop.f32.mrb[18].mxu0  ;;  %v2193_v52 = vpop.f32.mrb[18].mxu1  ;;  %v2670_v33 = vadd.f32 1.0, %v5717_v20  ;;  %v5591_v20 = vld [vmem:[%s6645_s3 + $0x128] sm:$0xff]  }
 0x18a   :  { %v2812_v62 = vmul.f32 %v2776_v39, %v2193_v52  ;;  %v6149_v10 = vpop.f32.mrb[19].mxu0  ;;  %v2195_v63 = vpop.f32.mrb[19].mxu1  ;;  %v2866_v8 = vmul.f32 %v2830_v4, %v2794_v40  ;;  %v2671_v39 = vadd.f32 1.0, %v5719_v22  ;;  %v5577_v40 = vld [vmem:[%s6645_s3 + $0x150] sm:$0xff]   ;;  %5730 = vrcp.f32 %v2653_v25 }
 0x18b   :  { %v2813_v14 = vmul.f32 %v2777_v2, %v2195_v63  ;;  %v2867_v12 = vmul.f32 %v2831_v53, %v2795_v49  ;;  %v5725_v38 = vpop.eup %5724  ;;  %v2654_v2 = vadd.f32 1.0, %v5721_v24  ;;  %v2655_v4 = vadd.f32 1.0, %v5723_v26  ;;  %v5579_v52 = vld [vmem:[%s6645_s3 + $0x110] sm:$0xff]   ;;  %v5581_v53 = vld [vmem:[%s6645_s3 + $0x158] sm:$0xff]   ;;  %v5585_v63 = vld [vmem:[%s6645_s3 + $0x160] sm:$0xff]  }
 0x18c   :  { %v2884_v9 = vmul.f32 %v2848_v6, %v2812_v62  ;;  %v5727_v42 = vpop.eup %5726  ;;  %5732 = vrcp.f32 %v2670_v33  ;;  %v2672_v49 = vadd.f32 1.0, %v5725_v38  ;;  %v5583_v62 = vld [vmem:[%s6645_s3 + $0x118] sm:$0xff]   ;;  %v4745_v22 = vmul.f32 -1.442695, %v6062_v27 }
 0x18d   :  { %v2885_v13 = vmul.f32 %v2849_v1, %v2813_v14  ;;  %5734 = vrcp.f32 %v2671_v39  ;;  %v2673_v6 = vadd.f32 1.0, %v5727_v42  ;;  %v5729_v1 = vpop.eup %5728  ;;  %v5587_v14 = vld [vmem:[%s6645_s3 + $0x120] sm:$0xff]   ;;  %v4746_v33 = vmul.f32 -1.442695, %v6066_v29 }
 0x18e   :  { %v2902_v16 = vpack.c.bf16 %v2884_v9, %v2866_v8  ;;  %5736 = vrcp.f32 %v2654_v2  ;;  %v4743_v9 = vmul.f32 -1.442695, %v5968_v44  ;;  %v2760_v25 = vmul.f32 %v5729_v1, %v5948_v3  ;;  %v2833_v1 = vld [vmem:[%s6643_s1 + $0x18] sm:$0xff] }
 0x18f   :  { %v2903_v18 = vpack.c.bf16 %v2885_v13, %v2867_v12  ;;  %5738 = vrcp.f32 %v2655_v4  ;;  %v5589_v12 = vld [vmem:[%s6645_s3 + $0x168] sm:$0xff]   ;;  %v4764_v3 = vmul.f32 -1.442695, %v6080_v36 }
 0x190   :  { %5740 = vrcp.f32 %v2672_v49  ;;  %v5595_v49 = vld [vmem:[%s6645_s3 + $0x130] sm:$0xff]  }
 0x191   :  { %4104 = vmatprep.mubr.bf16.mxu0 %v2903_v18  ;;  %5742 = vrcp.f32 %v2673_v6 }
 0x192   :  { %4105 = vmatmul.mubr.bf16.vlgmr.msra.gmra.mrb[36].mxu0 %v2902_v16  ;;  %5744 = vpow2.f32 %v4743_v9  ;;  %v2850_v9 = vld [vmem:[%s6643_s1 + $0xa0] sm:$0xff] }
 0x193   :  { %4962 = vmatpush3.bf16.msra.mxu0 %v5571_v19  ;;  %v4762_v19 = vmul.f32 -1.442695, %v5980_v51  ;;  %5746 = vpow2.f32 %v4744_v15 }
 0x194   :  { %4963 = vmatprep.subr.bf16.mxu0 %v5573_v21  ;;  %v5731_v8 = vpop.eup %5730  ;;  %5748 = vpow2.f32 %v4761_v17 }
 0x195   :  { %v2761_v26 = vmul.f32 %v5731_v8, %v5952_v5  ;;  %5750 = vpow2.f32 %v4762_v19 }
 0x196   :  { %v5733_v13 = vpop.eup %5732  ;;  %5752 = vpow2.f32 %v4745_v22 }
 0x197   :  { %4964 = vmatpush3.bf16.msra.mxu0 %v5575_v34  ;;  %v5735_v16 = vpop.eup %5734  ;;  %v2778_v38 = vmul.f32 %v5733_v13, %v5956_v7  ;;  %5754 = vpow2.f32 %v4746_v33  ;;  %v2852_v13 = vld [vmem:[%s6643_s1 + $0xb0] sm:$0xff] }
 0x198   :  { %4965 = vmatprep.subr.bf16.mxu0 %v5577_v40  ;;  %v5737_v18 = vpop.eup %5736  ;;  %v4763_v40 = vmul.f32 -1.442695, %v6070_v31  ;;  %v2779_v42 = vmul.f32 %v5735_v16, %v5960_v11  ;;  %v2832_v11 = vld [vmem:[%s6643_s1 + $0x10] sm:$0xff] }
 0x199   :  { %v5739_v21 = vpop.eup %5738  ;;  %v2762_v39 = vmul.f32 %v5737_v18, %v5966_v43  ;;  %v2851_v18 = vld [vmem:[%s6643_s1 + $0xa8] sm:$0xff] }
 0x19a   :  { %v5741_v24 = vpop.eup %5740  ;;  %v2763_v2 = vmul.f32 %v5739_v21, %v5970_v45  ;;  %v2834_v45 = vld [vmem:[%s6643_s1 + $0x20] sm:$0xff]  ;;  %5756 = vpow2.f32 %v4763_v40 }
 0x19b   :  { %4966 = vmatpush3.bf16.msra.mxu0 %v5579_v52  ;;  %v5743_v34 = vpop.eup %5742  ;;  %v2780_v7 = vmul.f32 %v5741_v24, %v5974_v47  ;;  %5758 = vpow2.f32 %v4764_v3 }
 0x19c   :  { %4967 = vmatprep.subr.bf16.mxu0 %v5581_v53  ;;  %v2781_v47 = vmul.f32 %v5743_v34, %v5978_v35  ;;  %v2835_v35 = vld [vmem:[%s6643_s1 + $0x28] sm:$0xff]  ;;  %v5601_v34 = vld [vmem:[%s6645_s3 + $0x240] sm:$0xff]  }
 0x19f   :  { %4968 = vmatpush3.bf16.msra.mxu0 %v5583_v62  ;;  %v5597_v62 = vld [vmem:[%s6645_s3 + $0x178] sm:$0xff]  }
 0x1a0   :  { %4969 = vmatprep.subr.bf16.mxu0 %v5585_v63 }
 0x1a3   :  { %4970 = vmatpush3.bf16.msra.mxu0 %v5587_v14 }
 0x1a4   :  { %4971 = vmatprep.subr.bf16.mxu0 %v5589_v12 }
 0x1a7   :  { %v2232_v4 = vpop.f32.mrb[20].mxu0  ;;  %v2275_v5 = vpop.f32.mrb[20].mxu1  ;;  %4972 = vmatpush3.bf16.msra.mxu0 %v5591_v20  ;;  %v2853_v20 = vld [vmem:[%s6643_s1 + $0xb8] sm:$0xff] }
 0x1a8   :  { %v2796_v43 = vmul.f32 %v2760_v25, %v2232_v4  ;;  %v2798_v52 = vmul.f32 %v2762_v39, %v2275_v5  ;;  %v2234_v6 = vpop.f32.mrb[21].mxu0  ;;  %v2277_v53 = vpop.f32.mrb[21].mxu1  ;;  %4973 = vmatprep.subr.bf16.mxu0 %v5593_v23  ;;  %v5599_v23 = vld [vmem:[%s6645_s3 + $0x138] sm:$0xff]  }
 0x1a9   :  { %v2797_v63 = vmul.f32 %v2761_v26, %v2234_v6  ;;  %v2799_v14 = vmul.f32 %v2763_v2, %v2277_v53  ;;  %v2236_v8 = vpop.f32.mrb[22].mxu0  ;;  %v2279_v12 = vpop.f32.mrb[22].mxu1  ;;  %v5605_v6 = vld [vmem:[%s6645_s3 + $0x248] sm:$0xff]  }
 0x1aa   :  { %v2814_v15 = vmul.f32 %v2778_v38, %v2236_v8  ;;  %v2816_v16 = vmul.f32 %v2780_v7, %v2279_v12  ;;  %v2238_v17 = vpop.f32.mrb[23].mxu0  ;;  %v2281_v19 = vpop.f32.mrb[23].mxu1  ;;  %v2868_v24 = vmul.f32 %v2832_v11, %v2796_v43  ;;  %v2870_v25 = vmul.f32 %v2834_v45, %v2798_v52  ;;  %v5602_v43 = vld [vmem:[%s6645_s3 + $0x180] sm:$0xff]   ;;  %v5604_v45 = vld [vmem:[%s6645_s3 + $0x1c8] sm:$0xff]  }
 0x1ab   :  { %v2815_v21 = vmul.f32 %v2779_v42, %v2238_v17  ;;  %v2817_v22 = vmul.f32 %v2781_v47, %v2281_v19  ;;  %4974 = vmatpush3.bf16.msra.mxu0 %v5595_v49  ;;  %v2869_v38 = vmul.f32 %v2833_v1, %v2797_v63  ;;  %v2871_v39 = vmul.f32 %v2835_v35, %v2799_v14  ;;  %v5745_v42 = vpop.eup %5744  ;;  %v5603_v11 = vld [vmem:[%s6645_s3 + $0x200] sm:$0xff]   ;;  %v5606_v8 = vld [vmem:[%s6645_s3 + $0x188] sm:$0xff]   ;;  %v5608_v35 = vld [vmem:[%s6645_s3 + $0x1d0] sm:$0xff]  }
 0x1ac   :  { %v2886_v26 = vmul.f32 %v2850_v9, %v2814_v15  ;;  %v2888_v33 = vmul.f32 %v2852_v13, %v2816_v16  ;;  %4975 = vmatprep.subr.bf16.mxu0 %v5597_v62  ;;  %v5747_v5 = vpop.eup %5746  ;;  %v2656_v62 = vadd.f32 1.0, %v5745_v42  ;;  %v5607_v9 = vld [vmem:[%s6645_s3 + $0x208] sm:$0xff]   ;;  %v5609_v15 = vld [vmem:[%s6645_s3 + $0x250] sm:$0xff]   ;;  %v4747_v42 = vmul.f32 -1.442695, %v6064_v28 }
 0x1ad   :  { %v2887_v40 = vmul.f32 %v2851_v18, %v2815_v21  ;;  %v2889_v2 = vmul.f32 %v2853_v20, %v2817_v22  ;;  %v5749_v52 = vpop.eup %5748  ;;  %v2657_v63 = vadd.f32 1.0, %v5747_v5  ;;  %v5610_v20 = vld [vmem:[%s6645_s3 + $0x190] sm:$0xff]  }
 0x1ae   :  { %v2904_v3 = vpack.c.bf16 %v2886_v26, %v2868_v24  ;;  %v2906_v4 = vpack.c.bf16 %v2888_v33, %v2870_v25  ;;  %v5751_v53 = vpop.eup %5750  ;;  %v2674_v14 = vadd.f32 1.0, %v5749_v52  ;;  %5760 = vrcp.f32 %v2656_v62  ;;  %v5611_v21 = vld [vmem:[%s6645_s3 + $0x210] sm:$0xff]   ;;  %v5613_v24 = vld [vmem:[%s6645_s3 + $0x258] sm:$0xff]   ;;  %v5616_v33 = vld [vmem:[%s6645_s3 + $0x1e0] sm:$0xff]  }
 0x1af   :  { %4976 = vmatpush3.bf16.msra.mxu0 %v5599_v23  ;;  %v2905_v49 = vpack.c.bf16 %v2887_v40, %v2869_v38  ;;  %v2907_v7 = vpack.c.bf16 %v2889_v2, %v2871_v39  ;;  %v5753_v47 = vpop.eup %5752  ;;  %v2675_v13 = vadd.f32 1.0, %v5751_v53  ;;  %5762 = vrcp.f32 %v2657_v63  ;;  %v5612_v23 = vld [vmem:[%s6645_s3 + $0x1d8] sm:$0xff]   ;;  %v5618_v39 = vld [vmem:[%s6645_s3 + $0x1a0] sm:$0xff]   ;;  %v5625_v63 = vld [vmem:[%s6645_s3 + $0x270] sm:$0xff]  }
 0x1b0   :  { %5005 = vmatprep.subr.bf16.mxu0 %v5601_v34  ;;  %v5755_v1 = vpop.eup %5754  ;;  %v2658_v17 = vadd.f32 1.0, %v5753_v47  ;;  %5764 = vrcp.f32 %v2674_v14  ;;  %v5614_v25 = vld [vmem:[%s6645_s3 + $0x198] sm:$0xff]   ;;  %v5617_v34 = vld [vmem:[%s6645_s3 + $0x260] sm:$0xff]   ;;  %v4766_v52 = vmul.f32 -1.442695, %v6082_v37  ;;  %v5624_v47 = vld [vmem:[%s6645_s3 + $0x1f0] sm:$0xff]  }
 0x1b1   :  { %4145 = vmatprep.mubr.bf16.mxu1 %v2905_v49  ;;  %4186 = vmatprep.mubr.bf16.mxu0 %v2907_v7  ;;  %v5757_v12 = vpop.eup %5756  ;;  %v2659_v18 = vadd.f32 1.0, %v5755_v1  ;;  %5766 = vrcp.f32 %v2675_v13  ;;  %v5615_v26 = vld [vmem:[%s6645_s3 + $0x218] sm:$0xff]   ;;  %v5619_v40 = vld [vmem:[%s6645_s3 + $0x220] sm:$0xff]   ;;  %v4748_v49 = vmul.f32 -1.442695, %v6068_v30 }
 0x1b2   :  { %4146 = vmatmul.mubr.bf16.vlgmr.msra.gmra.mrb[36].mxu1 %v2904_v3  ;;  %4187 = vmatmul.mubr.bf16.vlgmr.msra.gmra.mrb[40].mxu0 %v2906_v4  ;;  %v5759_v16 = vpop.eup %5758  ;;  %v2676_v19 = vadd.f32 1.0, %v5757_v12  ;;  %5768 = vrcp.f32 %v2658_v17  ;;  %v5620_v3 = vld [vmem:[%s6645_s3 + $0x1e8] sm:$0xff]   ;;  %v4749_v62 = vmul.f32 -1.442695, %v6106_v54 }
 0x1b3   :  { %4984 = vmatpush3.bf16.msra.mxu1 %v5602_v43  ;;  %5006 = vmatpush3.bf16.msra.mxu0 %v5603_v11  ;;  %v2677_v22 = vadd.f32 1.0, %v5759_v16  ;;  %5770 = vrcp.f32 %v2659_v18  ;;  %v5621_v4 = vld [vmem:[%s6645_s3 + $0x268] sm:$0xff]   ;;  %v4765_v43 = vmul.f32 -1.442695, %v6072_v32  ;;  %v2836_v16 = vld [vmem:[%s6643_s1 + $0x30] sm:$0xff] }
 0x1b4   :  { %4985 = vmatprep.subr.bf16.mxu1 %v5604_v45  ;;  %5007 = vmatprep.subr.bf16.mxu0 %v5605_v6  ;;  %5772 = vrcp.f32 %v2676_v19  ;;  %v5622_v45 = vld [vmem:[%s6645_s3 + $0x1a8] sm:$0xff]  }
 0x1b5   :  { %5774 = vrcp.f32 %v2677_v22  ;;  %v5623_v6 = vld [vmem:[%s6645_s3 + $0x228] sm:$0xff]   ;;  %v2837_v22 = vld [vmem:[%s6643_s1 + $0x38] sm:$0xff] }
 0x1b6   :  { %5776 = vpow2.f32 %v4747_v42 }
 0x1b7   :  { %4986 = vmatpush3.bf16.msra.mxu1 %v5606_v8  ;;  %5008 = vmatpush3.bf16.msra.mxu0 %v5607_v9  ;;  %5778 = vpow2.f32 %v4748_v49  ;;  %v4750_v9 = vmul.f32 -1.442695, %v6110_v56 }
 0x1b8   :  { %4987 = vmatprep.subr.bf16.mxu1 %v5608_v35  ;;  %5009 = vmatprep.subr.bf16.mxu0 %v5609_v15  ;;  %v5761_v38 = vpop.eup %5760  ;;  %5780 = vpow2.f32 %v4765_v43  ;;  %v4767_v15 = vmul.f32 -1.442695, %v6114_v58 }
 0x1b9   :  { %v5763_v2 = vpop.eup %5762  ;;  %v2764_v14 = vmul.f32 %v5761_v38, %v5968_v44  ;;  %5782 = vpow2.f32 %v4766_v52  ;;  %v2854_v38 = vld [vmem:[%s6643_s1 + $0xc0] sm:$0xff] }
 0x1ba   :  { %v5765_v5 = vpop.eup %5764  ;;  %v2765_v8 = vmul.f32 %v5763_v2, %v5972_v46  ;;  %v4768_v46 = vmul.f32 -1.442695, %v6118_v60  ;;  %5784 = vpow2.f32 %v4749_v62  ;;  %v5629_v2 = vld [vmem:[%s6645_s3 + $0x278] sm:$0xff]  }
 0x1bb   :  { %4988 = vmatpush3.bf16.msra.mxu1 %v5610_v20  ;;  %5010 = vmatpush3.bf16.msra.mxu0 %v5611_v21  ;;  %v5767_v7 = vpop.eup %5766  ;;  %v2782_v13 = vmul.f32 %v5765_v5, %v5976_v48  ;;  %v2838_v48 = vld [vmem:[%s6643_s1 + $0x40] sm:$0xff]  ;;  %5786 = vpow2.f32 %v4750_v9  ;;  %v2855_v5 = vld [vmem:[%s6643_s1 + $0xc8] sm:$0xff] }
 0x1bc   :  { %4989 = vmatprep.subr.bf16.mxu1 %v5612_v23  ;;  %5011 = vmatprep.subr.bf16.mxu0 %v5613_v24  ;;  %v5769_v11 = vpop.eup %5768  ;;  %v2783_v17 = vmul.f32 %v5767_v7, %v5980_v51  ;;  %v5627_v24 = vld [vmem:[%s6645_s3 + $0x230] sm:$0xff]   ;;  %5788 = vpow2.f32 %v4767_v15  ;;  %v2857_v7 = vld [vmem:[%s6643_s1 + $0xd8] sm:$0xff]  ;;  %v5633_v15 = vld [vmem:[%s6645_s3 + $0x340] sm:$0xff]  }
 0x1bd   :  { %v5771_v53 = vpop.eup %5770  ;;  %v2766_v35 = vmul.f32 %v5769_v11, %v6062_v27  ;;  %v5626_v27 = vld [vmem:[%s6645_s3 + $0x1b0] sm:$0xff]   ;;  %5790 = vpow2.f32 %v4768_v46  ;;  %v5634_v46 = vld [vmem:[%s6645_s3 + $0x280] sm:$0xff]  }
 0x1be   :  { %v5773_v1 = vpop.eup %5772  ;;  %v2767_v44 = vmul.f32 %v5771_v53, %v6066_v29 }
 0x1bf   :  { %4990 = vmatpush3.bf16.msra.mxu1 %v5614_v25  ;;  %5012 = vmatpush3.bf16.msra.mxu0 %v5615_v26  ;;  %v5775_v12 = vpop.eup %5774  ;;  %v2784_v20 = vmul.f32 %v5773_v1, %v6070_v31  ;;  %v5628_v25 = vld [vmem:[%s6645_s3 + $0x1f8] sm:$0xff]  }
 0x1c0   :  { %4991 = vmatprep.subr.bf16.mxu1 %v5616_v33  ;;  %5013 = vmatprep.subr.bf16.mxu0 %v5617_v34  ;;  %v2785_v31 = vmul.f32 %v5775_v12, %v6080_v36  ;;  %v2839_v36 = vld [vmem:[%s6643_s1 + $0x48] sm:$0xff]  ;;  %v5777_v12 = vpop.eup %5776 }
 0x1c3   :  { %4992 = vmatpush3.bf16.msra.mxu1 %v5618_v39  ;;  %5014 = vmatpush3.bf16.msra.mxu0 %v5619_v40  ;;  %v2856_v40 = vld [vmem:[%s6643_s1 + $0xd0] sm:$0xff] }
 0x1c4   :  { %4993 = vmatprep.subr.bf16.mxu1 %v5620_v3  ;;  %5015 = vmatprep.subr.bf16.mxu0 %v5621_v4 }
 0x1c7   :  { %v2318_v18 = vpop.f32.mrb[24].mxu0  ;;  %v2361_v19 = vpop.f32.mrb[24].mxu1  ;;  %4994 = vmatpush3.bf16.msra.mxu1 %v5622_v45  ;;  %5016 = vmatpush3.bf16.msra.mxu0 %v5623_v6  ;;  %v5630_v45 = vld [vmem:[%s6645_s3 + $0x1b8] sm:$0xff]  }
 0x1c8   :  { %v2800_v51 = vmul.f32 %v2764_v14, %v2318_v18  ;;  %v2802_v29 = vmul.f32 %v2766_v35, %v2361_v19  ;;  %v2320_v21 = vpop.f32.mrb[25].mxu0  ;;  %v2363_v23 = vpop.f32.mrb[25].mxu1  ;;  %4995 = vmatprep.subr.bf16.mxu1 %v5624_v47  ;;  %5017 = vmatprep.subr.bf16.mxu0 %v5625_v63  ;;  %v5631_v47 = vld [vmem:[%s6645_s3 + $0x238] sm:$0xff]   ;;  %v5632_v63 = vld [vmem:[%s6645_s3 + $0x2c0] sm:$0xff]  }
 0x1c9   :  { %v2801_v26 = vmul.f32 %v2765_v8, %v2320_v21  ;;  %v2803_v33 = vmul.f32 %v2767_v44, %v2363_v23  ;;  %v2322_v34 = vpop.f32.mrb[26].mxu0  ;;  %v2365_v39 = vpop.f32.mrb[26].mxu1  ;;  %v5635_v19 = vld [vmem:[%s6645_s3 + $0x300] sm:$0xff]  }
 0x1ca   :  { %v2818_v42 = vmul.f32 %v2782_v13, %v2322_v34  ;;  %v2820_v3 = vmul.f32 %v2784_v20, %v2365_v39  ;;  %v2324_v4 = vpop.f32.mrb[27].mxu0  ;;  %v2367_v49 = vpop.f32.mrb[27].mxu1  ;;  %v2872_v43 = vmul.f32 %v2836_v16, %v2800_v51  ;;  %v2874_v6 = vmul.f32 %v2838_v48, %v2802_v29  ;;  %v5636_v48 = vld [vmem:[%s6645_s3 + $0x2c8] sm:$0xff]   ;;  %v5641_v39 = vld [vmem:[%s6645_s3 + $0x350] sm:$0xff]  }
 0x1cb   :  { %v2819_v11 = vmul.f32 %v2783_v17, %v2324_v4  ;;  %v2821_v52 = vmul.f32 %v2785_v31, %v2367_v49  ;;  %4996 = vmatpush3.bf16.msra.mxu1 %v5626_v27  ;;  %5018 = vmatpush3.bf16.msra.mxu0 %v5627_v24  ;;  %v2873_v1 = vmul.f32 %v2837_v22, %v2801_v26  ;;  %v5779_v16 = vpop.eup %5778  ;;  %v2660_v20 = vadd.f32 1.0, %v5777_v12  ;;  %v5637_v51 = vld [vmem:[%s6645_s3 + $0x348] sm:$0xff]   ;;  %v5644_v4 = vld [vmem:[%s6645_s3 + $0x2d8] sm:$0xff]  }
 0x1cc   :  { %v2890_v53 = vmul.f32 %v2854_v38, %v2818_v42  ;;  %v2892_v62 = vmul.f32 %v2856_v40, %v2820_v3  ;;  %4997 = vmatprep.subr.bf16.mxu1 %v5628_v25  ;;  %v2875_v14 = vmul.f32 %v2839_v36, %v2803_v33  ;;  %5019 = vmatprep.subr.bf16.mxu0 %v5629_v2  ;;  %v5781_v18 = vpop.eup %5780  ;;  %v2661_v21 = vadd.f32 1.0, %v5779_v16  ;;  %v5638_v24 = vld [vmem:[%s6645_s3 + $0x288] sm:$0xff]   ;;  %v5640_v33 = vld [vmem:[%s6645_s3 + $0x2d0] sm:$0xff]   ;;  %v5646_v49 = vld [vmem:[%s6645_s3 + $0x298] sm:$0xff]  }
 0x1cd   :  { %v2891_v8 = vmul.f32 %v2855_v5, %v2819_v11  ;;  %v2893_v9 = vmul.f32 %v2857_v7, %v2821_v52  ;;  %v5783_v27 = vpop.eup %5782  ;;  %v2678_v23 = vadd.f32 1.0, %v5781_v18  ;;  %v5639_v26 = vld [vmem:[%s6645_s3 + $0x308] sm:$0xff]   ;;  %5792 = vrcp.f32 %v2660_v20  ;;  %v5642_v36 = vld [vmem:[%s6645_s3 + $0x290] sm:$0xff]   ;;  %v5645_v5 = vld [vmem:[%s6645_s3 + $0x358] sm:$0xff]  }
 0x1ce   :  { %v2908_v13 = vpack.c.bf16 %v2890_v53, %v2872_v43  ;;  %v2910_v35 = vpack.c.bf16 %v2892_v62, %v2874_v6  ;;  %v5785_v29 = vpop.eup %5784  ;;  %v2679_v31 = vadd.f32 1.0, %v5783_v27  ;;  %5794 = vrcp.f32 %v2661_v21  ;;  %v5643_v3 = vld [vmem:[%s6645_s3 + $0x310] sm:$0xff]   ;;  %v5647_v7 = vld [vmem:[%s6645_s3 + $0x318] sm:$0xff]   ;;  %v5648_v43 = vld [vmem:[%s6645_s3 + $0x2e0] sm:$0xff]  }
 0x1cf   :  { %4998 = vmatpush3.bf16.msra.mxu1 %v5630_v45  ;;  %v2909_v17 = vpack.c.bf16 %v2891_v8, %v2873_v1  ;;  %v2911_v44 = vpack.c.bf16 %v2893_v9, %v2875_v14  ;;  %5020 = vmatpush3.bf16.msra.mxu0 %v5631_v47  ;;  %v5787_v22 = vpop.eup %5786  ;;  %v2662_v38 = vadd.f32 1.0, %v5785_v29  ;;  %5796 = vrcp.f32 %v2678_v23  ;;  %v5649_v11 = vld [vmem:[%s6645_s3 + $0x360] sm:$0xff]   ;;  %v5652_v47 = vld [vmem:[%s6645_s3 + $0x2e8] sm:$0xff]   ;;  %v5657_v27 = vld [vmem:[%s6645_s3 + $0x370] sm:$0xff]  }
 0x1d0   :  { %5027 = vmatprep.subr.bf16.mxu1 %v5632_v63  ;;  %5049 = vmatprep.subr.bf16.mxu0 %v5633_v15  ;;  %v5789_v25 = vpop.eup %5788  ;;  %v2663_v40 = vadd.f32 1.0, %v5787_v22  ;;  %5798 = vrcp.f32 %v2679_v31  ;;  %v5650_v45 = vld [vmem:[%s6645_s3 + $0x2a0] sm:$0xff]   ;;  %v4751_v53 = vmul.f32 -1.442695, %v6108_v55  ;;  %v4752_v1 = vmul.f32 -1.442695, %v6112_v57 }
 0x1d1   :  { %4227 = vmatprep.mubr.bf16.mxu1 %v2909_v17  ;;  %4268 = vmatprep.mubr.bf16.mxu0 %v2911_v44  ;;  %v5791_v34 = vpop.eup %5790  ;;  %v2680_v2 = vadd.f32 1.0, %v5789_v25  ;;  %5800 = vrcp.f32 %v2662_v38  ;;  %v5651_v62 = vld [vmem:[%s6645_s3 + $0x320] sm:$0xff]   ;;  %v5653_v14 = vld [vmem:[%s6645_s3 + $0x368] sm:$0xff]   ;;  %v4769_v9 = vmul.f32 -1.442695, %v6116_v59  ;;  %v5656_v44 = vld [vmem:[%s6645_s3 + $0x2f0] sm:$0xff]  }
 0x1d2   :  { %4228 = vmatmul.mubr.bf16.vlgmr.msra.gmra.mrb[40].mxu1 %v2908_v13  ;;  %4269 = vmatmul.mubr.bf16.vlgmr.msra.gmra.mrb[44].mxu0 %v2910_v35  ;;  %v2681_v42 = vadd.f32 1.0, %v5791_v34  ;;  %5802 = vrcp.f32 %v2663_v40  ;;  %v4770_v13 = vmul.f32 -1.442695, %v6120_v61  ;;  %v5654_v35 = vld [vmem:[%s6645_s3 + $0x2a8] sm:$0xff]   ;;  %v4753_v16 = vmul.f32 -1.442695, %v6132_v0 }
 0x1d3   :  { %5028 = vmatpush3.bf16.msra.mxu1 %v5634_v46  ;;  %5050 = vmatpush3.bf16.msra.mxu0 %v5635_v19  ;;  %5804 = vrcp.f32 %v2680_v2  ;;  %v5655_v17 = vld [vmem:[%s6645_s3 + $0x328] sm:$0xff]   ;;  %v4771_v21 = vmul.f32 -1.442695, %v6141_v50  ;;  %v4772_v23 = vmul.f32 -1.442695, %v6149_v10  ;;  %v5659_v38 = vld [vmem:[%s6645_s3 + $0x330] sm:$0xff]  }
 0x1d4   :  { %5029 = vmatprep.subr.bf16.mxu1 %v5636_v48  ;;  %5051 = vmatprep.subr.bf16.mxu0 %v5637_v51  ;;  %5806 = vrcp.f32 %v2681_v42  ;;  %v4754_v48 = vmul.f32 -1.442695, %v6135_v41  ;;  %v2858_v42 = vld [vmem:[%s6643_s1 + $0xe0] sm:$0xff] }
 0x1d5   :  { %5808 = vpow2.f32 %v4751_v53 }
 0x1d6   :  { %5810 = vpow2.f32 %v4752_v1 }
 0x1d7   :  { %5030 = vmatpush3.bf16.msra.mxu1 %v5638_v24  ;;  %5052 = vmatpush3.bf16.msra.mxu0 %v5639_v26  ;;  %v5793_v52 = vpop.eup %5792  ;;  %5812 = vpow2.f32 %v4769_v9  ;;  %v5664_v9 = vld [vmem:[%s6645_s3 + $0x3c0] sm:$0xff]  }
 0x1d8   :  { %5031 = vmatprep.subr.bf16.mxu1 %v5640_v33  ;;  %5053 = vmatprep.subr.bf16.mxu0 %v5641_v39  ;;  %v5795_v6 = vpop.eup %5794  ;;  %v2768_v18 = vmul.f32 %v5793_v52, %v6064_v28  ;;  %v2840_v28 = vld [vmem:[%s6643_s1 + $0x50] sm:$0xff]  ;;  %5814 = vpow2.f32 %v4770_v13  ;;  %v2841_v33 = vld [vmem:[%s6643_s1 + $0x58] sm:$0xff] }
 0x1d9   :  { %v5797_v63 = vpop.eup %5796  ;;  %v2769_v19 = vmul.f32 %v5795_v6, %v6068_v30  ;;  %5816 = vpow2.f32 %v4753_v16  ;;  %v5660_v39 = vld [vmem:[%s6645_s3 + $0x2f8] sm:$0xff]  }
 0x1da   :  { %v5799_v8 = vpop.eup %5798  ;;  %v2786_v51 = vmul.f32 %v5797_v63, %v6072_v32  ;;  %v2842_v32 = vld [vmem:[%s6643_s1 + $0x60] sm:$0xff]  ;;  %5818 = vpow2.f32 %v4754_v48 }
 0x1db   :  { %5032 = vmatpush3.bf16.msra.mxu1 %v5642_v36  ;;  %5054 = vmatpush3.bf16.msra.mxu0 %v5643_v3  ;;  %v5801_v12 = vpop.eup %5800  ;;  %v2787_v30 = vmul.f32 %v5799_v8, %v6082_v37  ;;  %5820 = vpow2.f32 %v4771_v21  ;;  %v5663_v8 = vld [vmem:[%s6645_s3 + $0x338] sm:$0xff]  }
 0x1dc   :  { %5033 = vmatprep.subr.bf16.mxu1 %v5644_v4  ;;  %5055 = vmatprep.subr.bf16.mxu0 %v5645_v5  ;;  %v5803_v15 = vpop.eup %5802  ;;  %v2770_v29 = vmul.f32 %v5801_v12, %v6106_v54  ;;  %v5658_v54 = vld [vmem:[%s6645_s3 + $0x2b0] sm:$0xff]   ;;  %v5661_v5 = vld [vmem:[%s6645_s3 + $0x378] sm:$0xff]   ;;  %5822 = vpow2.f32 %v4772_v23 }
 0x1dd   :  { %v5805_v46 = vpop.eup %5804  ;;  %v2771_v22 = vmul.f32 %v5803_v15, %v6110_v56  ;;  %v2860_v4 = vld [vmem:[%s6643_s1 + $0xf0] sm:$0xff] }
 0x1de   :  { %v5807_v20 = vpop.eup %5806  ;;  %v2788_v31 = vmul.f32 %v5805_v46, %v6114_v58  ;;  %v5665_v46 = vld [vmem:[%s6645_s3 + $0x440] sm:$0xff]  }
 0x1df   :  { %5034 = vmatpush3.bf16.msra.mxu1 %v5646_v49  ;;  %5056 = vmatpush3.bf16.msra.mxu0 %v5647_v7  ;;  %v2789_v58 = vmul.f32 %v5807_v20, %v6118_v60  ;;  %v2843_v60 = vld [vmem:[%s6643_s1 + $0x68] sm:$0xff]  ;;  %v5809_v16 = vpop.eup %5808 }
 0x1e0   :  { %5035 = vmatprep.subr.bf16.mxu1 %v5648_v43  ;;  %5057 = vmatprep.subr.bf16.mxu0 %v5649_v11  ;;  %v2859_v11 = vld [vmem:[%s6643_s1 + $0xe8] sm:$0xff] }
 0x1e3   :  { %5036 = vmatpush3.bf16.msra.mxu1 %v5650_v45  ;;  %5058 = vmatpush3.bf16.msra.mxu0 %v5651_v62  ;;  %v2861_v45 = vld [vmem:[%s6643_s1 + $0xf8] sm:$0xff] }
 0x1e4   :  { %5037 = vmatprep.subr.bf16.mxu1 %v5652_v47  ;;  %5059 = vmatprep.subr.bf16.mxu0 %v5653_v14  ;;  %v5662_v47 = vld [vmem:[%s6645_s3 + $0x2b8] sm:$0xff]  }
 0x1e7   :  { %v2404_v24 = vpop.f32.mrb[28].mxu0  ;;  %v2447_v25 = vpop.f32.mrb[28].mxu1  ;;  %5038 = vmatpush3.bf16.msra.mxu1 %v5654_v35  ;;  %5060 = vmatpush3.bf16.msra.mxu0 %v5655_v17 }
 0x1e8   :  { %v2804_v37 = vmul.f32 %v2768_v18, %v2404_v24  ;;  %v2806_v26 = vmul.f32 %v2770_v29, %v2447_v25  ;;  %v2406_v56 = vpop.f32.mrb[29].mxu0  ;;  %v2449_v34 = vpop.f32.mrb[29].mxu1  ;;  %5039 = vmatprep.subr.bf16.mxu1 %v5656_v44  ;;  %5061 = vmatprep.subr.bf16.mxu0 %v5657_v27  ;;  %v5666_v27 = vld [vmem:[%s6645_s3 + $0x380] sm:$0xff]   ;;  %v5668_v29 = vld [vmem:[%s6645_s3 + $0x3c8] sm:$0xff]  }
 0x1e9   :  { %v2805_v40 = vmul.f32 %v2769_v19, %v2406_v56  ;;  %v2807_v2 = vmul.f32 %v2771_v22, %v2449_v34  ;;  %v2408_v36 = vpop.f32.mrb[30].mxu0  ;;  %v2451_v3 = vpop.f32.mrb[30].mxu1  ;;  %v5673_v34 = vld [vmem:[%s6645_s3 + $0x450] sm:$0xff]  }
 0x1ea   :  { %v2822_v49 = vmul.f32 %v2786_v51, %v2408_v36  ;;  %v2824_v7 = vmul.f32 %v2788_v31, %v2451_v3  ;;  %v2410_v43 = vpop.f32.mrb[31].mxu0  ;;  %v2453_v52 = vpop.f32.mrb[31].mxu1  ;;  %v2876_v6 = vmul.f32 %v2840_v28, %v2804_v37  ;;  %v2878_v63 = vmul.f32 %v2842_v32, %v2806_v26  ;;  %v5667_v51 = vld [vmem:[%s6645_s3 + $0x400] sm:$0xff]   ;;  %v5670_v32 = vld [vmem:[%s6645_s3 + $0x388] sm:$0xff]   ;;  %v5672_v26 = vld [vmem:[%s6645_s3 + $0x3d0] sm:$0xff]  }
 0x1eb   :  { %v2823_v53 = vmul.f32 %v2787_v30, %v2410_v43  ;;  %v2825_v62 = vmul.f32 %v2789_v58, %v2453_v52  ;;  %5040 = vmatpush3.bf16.msra.mxu1 %v5658_v54  ;;  %5062 = vmatpush3.bf16.msra.mxu0 %v5659_v38  ;;  %v2877_v12 = vmul.f32 %v2841_v33, %v2805_v40  ;;  %v5811_v18 = vpop.eup %5810  ;;  %v2664_v28 = vadd.f32 1.0, %v5809_v16  ;;  %v5669_v30 = vld [vmem:[%s6645_s3 + $0x448] sm:$0xff]   ;;  %v5674_v58 = vld [vmem:[%s6645_s3 + $0x390] sm:$0xff]   ;;  %v5676_v36 = vld [vmem:[%s6645_s3 + $0x3d8] sm:$0xff]  }
 0x1ec   :  { %v2894_v1 = vmul.f32 %v2858_v42, %v2822_v49  ;;  %v2896_v14 = vmul.f32 %v2860_v4, %v2824_v7  ;;  %5041 = vmatprep.subr.bf16.mxu1 %v5660_v39  ;;  %v2879_v13 = vmul.f32 %v2843_v60, %v2807_v2  ;;  %5063 = vmatprep.subr.bf16.mxu0 %v5661_v5  ;;  %v5813_v20 = vpop.eup %5812  ;;  %v2665_v23 = vadd.f32 1.0, %v5811_v18  ;;  %v5671_v37 = vld [vmem:[%s6645_s3 + $0x408] sm:$0xff]   ;;  %v5675_v2 = vld [vmem:[%s6645_s3 + $0x410] sm:$0xff]   ;;  %v5677_v42 = vld [vmem:[%s6645_s3 + $0x458] sm:$0xff]  }
 0x1ed   :  { %v2895_v35 = vmul.f32 %v2859_v11, %v2823_v53  ;;  %v2897_v15 = vmul.f32 %v2861_v45, %v2825_v62  ;;  %v5815_v21 = vpop.eup %5814  ;;  %v2682_v25 = vadd.f32 1.0, %v5813_v20  ;;  %5824 = vrcp.f32 %v2664_v28  ;;  %v5678_v3 = vld [vmem:[%s6645_s3 + $0x398] sm:$0xff]   ;;  %v5680_v5 = vld [vmem:[%s6645_s3 + $0x3e0] sm:$0xff]   ;;  %v5684_v52 = vld [vmem:[%s6645_s3 + $0x3e8] sm:$0xff]  }
 0x1ee   :  { %v2912_v17 = vpack.c.bf16 %v2894_v1, %v2876_v6  ;;  %v2914_v44 = vpack.c.bf16 %v2896_v14, %v2878_v63  ;;  %v5817_v22 = vpop.eup %5816  ;;  %v2683_v31 = vadd.f32 1.0, %v5815_v21  ;;  %5826 = vrcp.f32 %v2665_v23  ;;  %v5679_v4 = vld [vmem:[%s6645_s3 + $0x418] sm:$0xff]   ;;  %v5681_v60 = vld [vmem:[%s6645_s3 + $0x460] sm:$0xff]   ;;  %v5685_v6 = vld [vmem:[%s6645_s3 + $0x468] sm:$0xff]  }
 0x1ef   :  { %5042 = vmatpush3.bf16.msra.mxu1 %v5662_v47  ;;  %v2913_v19 = vpack.c.bf16 %v2895_v35, %v2877_v12  ;;  %v2915_v48 = vpack.c.bf16 %v2897_v15, %v2879_v13  ;;  %5064 = vmatpush3.bf16.msra.mxu0 %v5663_v8  ;;  %v5819_v24 = vpop.eup %5818  ;;  %v2666_v33 = vadd.f32 1.0, %v5817_v22  ;;  %5828 = vrcp.f32 %v2682_v25  ;;  %v5682_v7 = vld [vmem:[%s6645_s3 + $0x3a0] sm:$0xff]   ;;  %v5686_v47 = vld [vmem:[%s6645_s3 + $0x3a8] sm:$0xff]   ;;  %v5688_v14 = vld [vmem:[%s6645_s3 + $0x3f0] sm:$0xff]  }
 0x1f0   :  { %5071 = vmatprep.subr.bf16.mxu1 %v5664_v9  ;;  %5093 = vmatprep.subr.bf16.mxu0 %v5665_v46  ;;  %v5821_v54 = vpop.eup %5820  ;;  %v2667_v38 = vadd.f32 1.0, %v5819_v24  ;;  %5830 = vrcp.f32 %v2683_v31  ;;  %v5683_v11 = vld [vmem:[%s6645_s3 + $0x420] sm:$0xff]   ;;  %v5687_v1 = vld [vmem:[%s6645_s3 + $0x428] sm:$0xff]   ;;  %v5689_v9 = vld [vmem:[%s6645_s3 + $0x470] sm:$0xff]  }
 0x1f1   :  { %4309 = vmatprep.mubr.bf16.mxu1 %v2913_v19  ;;  %4350 = vmatprep.mubr.bf16.mxu0 %v2915_v48  ;;  %v5823_v56 = vpop.eup %5822  ;;  %v2684_v39 = vadd.f32 1.0, %v5821_v54  ;;  %5832 = vrcp.f32 %v2666_v33  ;;  %v2844_v46 = vld [vmem:[%s6643_s1 + $0x70] sm:$0xff]  ;;  %v2846_v19 = vld [vmem:[%s6643_s1 + $0x80] sm:$0xff]  ;;  %v2845_v48 = vld [vmem:[%s6643_s1 + $0x78] sm:$0xff] }
 0x1f2   :  { %4310 = vmatmul.mubr.bf16.vlgmr.msra.gmra.mrb[44].mxu1 %v2912_v17  ;;  %4351 = vmatmul.mubr.bf16.vlgmr.msra.gmra.mrb[48].mxu0 %v2914_v44  ;;  %v2685_v40 = vadd.f32 1.0, %v5823_v56  ;;  %5834 = vrcp.f32 %v2667_v38  ;;  %v5691_v20 = vld [vmem:[%s6645_s3 + $0x430] sm:$0xff]   ;;  %v2862_v22 = vld [vmem:[%s6643_s1 + $0x100] sm:$0xff]  ;;  %v5693_v25 = vld [vmem:[%s6645_s3 + $0x478] sm:$0xff]  }
 0x1f3   :  { %5072 = vmatpush3.bf16.msra.mxu1 %v5666_v27  ;;  %5094 = vmatpush3.bf16.msra.mxu0 %v5667_v51  ;;  %5836 = vrcp.f32 %v2684_v39  ;;  %v5692_v51 = vld [vmem:[%s6645_s3 + $0x3f8] sm:$0xff]   ;;  %v2864_v24 = vld [vmem:[%s6643_s1 + $0x110] sm:$0xff]  ;;  %v2863_v31 = vld [vmem:[%s6643_s1 + $0x108] sm:$0xff] }
 0x1f4   :  { %5073 = vmatprep.subr.bf16.mxu1 %v5668_v29  ;;  %5095 = vmatprep.subr.bf16.mxu0 %v5669_v30  ;;  %5838 = vrcp.f32 %v2685_v40  ;;  %v5694_v38 = vld [vmem:[%s6645_s3 + $0x3b8] sm:$0xff]  }
 0x1f7   :  { %5074 = vmatpush3.bf16.msra.mxu1 %v5670_v32  ;;  %5096 = vmatpush3.bf16.msra.mxu0 %v5671_v37  ;;  %v5825_v49 = vpop.eup %5824 }
 0x1f8   :  { %5075 = vmatprep.subr.bf16.mxu1 %v5672_v26  ;;  %5097 = vmatprep.subr.bf16.mxu0 %v5673_v34  ;;  %v5827_v43 = vpop.eup %5826  ;;  %v2772_v13 = vmul.f32 %v5825_v49, %v6108_v55  ;;  %v5690_v55 = vld [vmem:[%s6645_s3 + $0x3b0] sm:$0xff]   ;;  %v2865_v26 = vld [vmem:[%s6643_s1 + $0x118] sm:$0xff] }
 0x1f9   :  { %v5829_v45 = vpop.eup %5828  ;;  %v2773_v15 = vmul.f32 %v5827_v43, %v6112_v57 }
 0x1fa   :  { %v5831_v53 = vpop.eup %5830  ;;  %v2790_v16 = vmul.f32 %v5829_v45, %v6116_v59 }
 0x1fb   :  { %5076 = vmatpush3.bf16.msra.mxu1 %v5674_v58  ;;  %5098 = vmatpush3.bf16.msra.mxu0 %v5675_v2  ;;  %v5833_v62 = vpop.eup %5832  ;;  %v5695_v2 = vld [vmem:[%s6645_s3 + $0x438] sm:$0xff]  }
 0x1fc   :  { %5077 = vmatprep.subr.bf16.mxu1 %v5676_v36  ;;  %5099 = vmatprep.subr.bf16.mxu0 %v5677_v42  ;;  %v5835_v63 = vpop.eup %5834  ;;  %v2774_v35 = vmul.f32 %v5833_v62, %v6132_v0 }
 0x1fd   :  { %v5837_v8 = vpop.eup %5836  ;;  %v2775_v17 = vmul.f32 %v5835_v63, %v6135_v41 }
 0x1fe   :  { %v5839_v12 = vpop.eup %5838  ;;  %v2792_v57 = vmul.f32 %v5837_v8, %v6141_v50  ;;  %v2791_v50 = vmul.f32 %v5831_v53, %v6120_v61  ;;  %v2847_v61 = vld [vmem:[%s6643_s1 + $0x88] sm:$0xff] }
 0x1ff   :  { %5078 = vmatpush3.bf16.msra.mxu1 %v5678_v3  ;;  %5100 = vmatpush3.bf16.msra.mxu0 %v5679_v4  ;;  %v2793_v29 = vmul.f32 %v5839_v12, %v6149_v10 }
 0x200   :  { %5079 = vmatprep.subr.bf16.mxu1 %v5680_v5  ;;  %5101 = vmatprep.subr.bf16.mxu0 %v5681_v60 }
 0x203   :  { %5080 = vmatpush3.bf16.msra.mxu1 %v5682_v7  ;;  %5102 = vmatpush3.bf16.msra.mxu0 %v5683_v11 }
 0x204   :  { %5081 = vmatprep.subr.bf16.mxu1 %v5684_v52  ;;  %5103 = vmatprep.subr.bf16.mxu0 %v5685_v6 }
 0x207   :  { %v2490_v44 = vpop.f32.mrb[32].mxu0  ;;  %v2533_v18 = vpop.f32.mrb[32].mxu1  ;;  %5082 = vmatpush3.bf16.msra.mxu1 %v5686_v47  ;;  %5104 = vmatpush3.bf16.msra.mxu0 %v5687_v1 }
 0x208   :  { %v2808_v59 = vmul.f32 %v2772_v13, %v2490_v44  ;;  %v2810_v0 = vmul.f32 %v2774_v35, %v2533_v18  ;;  %v2492_v41 = vpop.f32.mrb[33].mxu0  ;;  %v2535_v27 = vpop.f32.mrb[33].mxu1  ;;  %5083 = vmatprep.subr.bf16.mxu1 %v5688_v14  ;;  %5105 = vmatprep.subr.bf16.mxu0 %v5689_v9 }
 0x209   :  { %v2809_v21 = vmul.f32 %v2773_v15, %v2492_v41  ;;  %v2811_v28 = vmul.f32 %v2775_v17, %v2535_v27  ;;  %v2494_v30 = vpop.f32.mrb[34].mxu0  ;;  %v2537_v23 = vpop.f32.mrb[34].mxu1 }
 0x20a   :  { %v2826_v10 = vmul.f32 %v2790_v16, %v2494_v30  ;;  %v2828_v32 = vmul.f32 %v2792_v57, %v2537_v23  ;;  %v2496_v54 = vpop.f32.mrb[35].mxu0  ;;  %v2539_v37 = vpop.f32.mrb[35].mxu1  ;;  %v2880_v56 = vmul.f32 %v2844_v46, %v2808_v59  ;;  %v2882_v39 = vmul.f32 %v2846_v19, %v2810_v0 }
 0x20b   :  { %v2827_v33 = vmul.f32 %v2791_v50, %v2496_v54  ;;  %v2829_v34 = vmul.f32 %v2793_v29, %v2539_v37  ;;  %5084 = vmatpush3.bf16.msra.mxu1 %v5690_v55  ;;  %5106 = vmatpush3.bf16.msra.mxu0 %v5691_v20  ;;  %v2881_v36 = vmul.f32 %v2845_v48, %v2809_v21 }
 0x20c   :  { %v2898_v58 = vmul.f32 %v2862_v22, %v2826_v10  ;;  %v2900_v40 = vmul.f32 %v2864_v24, %v2828_v32  ;;  %5085 = vmatprep.subr.bf16.mxu1 %v5692_v51  ;;  %v2883_v42 = vmul.f32 %v2847_v61, %v2811_v28  ;;  %5107 = vmatprep.subr.bf16.mxu0 %v5693_v25 }
 0x20d   :  { %v2899_v3 = vmul.f32 %v2863_v31, %v2827_v33  ;;  %v2901_v4 = vmul.f32 %v2865_v26, %v2829_v34 }
 0x20e   :  { %v2916_v5 = vpack.c.bf16 %v2898_v58, %v2880_v56  ;;  %v2918_v60 = vpack.c.bf16 %v2900_v40, %v2882_v39 }
 0x20f   :  { %5086 = vmatpush3.bf16.msra.mxu1 %v5694_v38  ;;  %v2917_v49 = vpack.c.bf16 %v2899_v3, %v2881_v36  ;;  %v2919_v7 = vpack.c.bf16 %v2901_v4, %v2883_v42  ;;  %5108 = vmatpush3.bf16.msra.mxu0 %v5695_v2 }
 0x211   :  { %4391 = vmatprep.mubr.bf16.mxu1 %v2917_v49  ;;  %4432 = vmatprep.mubr.bf16.mxu0 %v2919_v7 }
 0x212   :  { %4392 = vmatmul.mubr.bf16.vlgmr.msra.gmra.mrb[48].mxu1 %v2916_v5  ;;  %4433 = vmatmul.mubr.bf16.vlgmr.msra.gmra.mrb[52].mxu0 %v2918_v60 }
 0x265   :  { %v4933_v43 = vpop.f32.mrb[36].mxu0 }
 0x266   :  { %v4934_v11 = vpop.f32.mrb[37].mxu0 }
 0x267   :  { %v4935_v52 = vadd.f32 %v4934_v11, %v4933_v43  ;;  %v4936_v45 = vpop.f32.mrb[38].mxu0 }
 0x268   :  { %v4937_v6 = vpop.f32.mrb[39].mxu0 }
 0x269   :  { %v4938_v53 = vadd.f32 %v4937_v6, %v4936_v45 }
 0x285   :  { %v4955_v62 = vpop.f32.mrb[36].mxu1  ;;  %v4977_v47 = vpop.f32.mrb[40].mxu0 }
 0x286   :  { %v4956_v63 = vpop.f32.mrb[37].mxu1  ;;  %v4978_v1 = vpop.f32.mrb[41].mxu0 }
 0x287   :  { %v4957_v14 = vadd.f32 %v4956_v63, %v4955_v62  ;;  %v4979_v8 = vadd.f32 %v4978_v1, %v4977_v47  ;;  %v4958_v9 = vpop.f32.mrb[38].mxu1  ;;  %v4980_v12 = vpop.f32.mrb[42].mxu0 }
 0x288   :  { %v4959_v13 = vpop.f32.mrb[39].mxu1  ;;  %v4981_v35 = vpop.f32.mrb[43].mxu0 }
 0x289   :  { %v4148_v15 = vadd.f32 %v4957_v14, %v4935_v52  ;;  %v4960_v16 = vadd.f32 %v4959_v13, %v4958_v9  ;;  %v4982_v17 = vadd.f32 %v4981_v35, %v4980_v12 }
 0x28b   :  { %v4189_v44 = vadd.f32 %v4979_v8, %v4148_v15  ;;  %v4151_v46 = vadd.f32 %v4960_v16, %v4938_v53 }
 0x28d   :  { %v4192_v18 = vadd.f32 %v4982_v17, %v4151_v46 }
 0x2a5   :  { %v4999_v19 = vpop.f32.mrb[40].mxu1  ;;  %v5021_v55 = vpop.f32.mrb[44].mxu0 }
 0x2a6   :  { %v5000_v57 = vpop.f32.mrb[41].mxu1  ;;  %v5022_v0 = vpop.f32.mrb[45].mxu0 }
 0x2a7   :  { %v5001_v59 = vadd.f32 %v5000_v57, %v4999_v19  ;;  %v5002_v41 = vpop.f32.mrb[42].mxu1  ;;  %v5023_v48 = vadd.f32 %v5022_v0, %v5021_v55  ;;  %v5024_v27 = vpop.f32.mrb[46].mxu0 }
 0x2a8   :  { %v5003_v20 = vpop.f32.mrb[43].mxu1  ;;  %v5025_v29 = vpop.f32.mrb[47].mxu0 }
 0x2a9   :  { %v4230_v51 = vadd.f32 %v5001_v59, %v4189_v44  ;;  %v5004_v50 = vadd.f32 %v5003_v20, %v5002_v41  ;;  %v5026_v21 = vadd.f32 %v5025_v29, %v5024_v27 }
 0x2ab   :  { %v4271_v28 = vadd.f32 %v5023_v48, %v4230_v51  ;;  %v4233_v30 = vadd.f32 %v5004_v50, %v4192_v18 }
 0x2ad   :  { %v4274_v22 = vadd.f32 %v5026_v21, %v4233_v30 }
 0x2c5   :  { %v5043_v23 = vpop.f32.mrb[44].mxu1  ;;  %v5065_v24 = vpop.f32.mrb[48].mxu0 }
 0x2c6   :  { %v5044_v25 = vpop.f32.mrb[45].mxu1  ;;  %v5066_v10 = vpop.f32.mrb[49].mxu0 }
 0x2c7   :  { %v5045_v61 = vadd.f32 %v5044_v25, %v5043_v23  ;;  %v5046_v32 = vpop.f32.mrb[46].mxu1  ;;  %v5067_v54 = vadd.f32 %v5066_v10, %v5065_v24  ;;  %v5068_v31 = vpop.f32.mrb[50].mxu0 }
 0x2c8   :  { %v5047_v37 = vpop.f32.mrb[47].mxu1  ;;  %v5069_v33 = vpop.f32.mrb[51].mxu0 }
 0x2c9   :  { %v4312_v26 = vadd.f32 %v5045_v61, %v4271_v28  ;;  %v5048_v56 = vadd.f32 %v5047_v37, %v5046_v32  ;;  %v5070_v34 = vadd.f32 %v5069_v33, %v5068_v31 }
 0x2cb   :  { %v4353_v38 = vadd.f32 %v5067_v54, %v4312_v26  ;;  %v4315_v39 = vadd.f32 %v5048_v56, %v4274_v22 }
 0x2cd   :  { %v4356_v58 = vadd.f32 %v5070_v34, %v4315_v39 }
 0x2e5   :  { %v5087_v40 = vpop.f32.mrb[48].mxu1  ;;  %v5109_v2 = vpop.f32.mrb[52].mxu0 }
 0x2e6   :  { %v5088_v36 = vpop.f32.mrb[49].mxu1  ;;  %v5110_v3 = vpop.f32.mrb[53].mxu0 }
 0x2e7   :  { %v5089_v42 = vadd.f32 %v5088_v36, %v5087_v40  ;;  %v5090_v4 = vpop.f32.mrb[50].mxu1  ;;  %v5111_v5 = vadd.f32 %v5110_v3, %v5109_v2  ;;  %v5112_v60 = vpop.f32.mrb[54].mxu0 }
 0x2e8   :  { %v5091_v49 = vpop.f32.mrb[51].mxu1  ;;  %v5113_v11 = vpop.f32.mrb[55].mxu0 }
 0x2e9   :  { %v4394_v7 = vadd.f32 %v5089_v42, %v4353_v38  ;;  %v5092_v43 = vadd.f32 %v5091_v49, %v5090_v4  ;;  %v5114_v52 = vadd.f32 %v5113_v11, %v5112_v60 }
 0x2eb   :  { %v4435_v45 = vadd.f32 %v5111_v5, %v4394_v7  ;;  %v4397_v6 = vadd.f32 %v5092_v43, %v4356_v58 }
 0x2ed   :  { %4441 = vst [vmem:[%s6646_s4] sm:$0xff] %v4435_v45  ;;  %v4438_v53 = vadd.f32 %v5114_v52, %v4397_v6 }
 0x2ef   :  { %4442 = vst [vmem:[%s6646_s4 + $0x8] sm:$0xff] %v4438_v53 }
 0x2f0   :  { %4447 = vsyncpa [#allocation3], 1 }

</bundles_post_ra>
